<compile_context>
chip_gen: v6e
topology: v6e:2x2x1
jax: 0.10.0
libtpu: 0.0.40
codegen_flags: <defaults>
</compile_context>

<pallas_src>
import functools

import jax
import jax.numpy as jnp
from jax.experimental import pallas as pl
from jax.experimental.pallas import tpu as pltpu

_LOG2E = 1.4426950408889634


def _round_up(x, m):
    return ((x + m - 1) // m) * m


# ----------------------------------------------------------------------------
# Pallas kernel: per-pixel x per-gaussian clipped alpha (the P x N hot path)
# ----------------------------------------------------------------------------
def _rasterize_alpha_kernel(g_ref, out_ref, *, tile_p, width):
    # --- in-kernel pixel coordinates ------------------------------------
    # linear pixel index -> (px, py) with px = lin % W, py = lin // W.
    # f32 floor-division with a +/-1 correction: exact for lin < 2^24 and
    # avoids relying on vector integer div lowering.
    lin_i = (jax.lax.broadcasted_iota(jnp.int32, (tile_p, 1), 0)
             + pl.program_id(0) * tile_p)
    lin = lin_i.astype(jnp.float32)                       # (TP, 1)
    w_f = jnp.float32(width)
    py = jnp.floor(lin * jnp.float32(1.0 / width))
    px = lin - py * w_f                                   # exact integer in f32
    hi = jnp.where(px >= w_f, 1.0, 0.0)
    lo = jnp.where(px < 0.0, 1.0, 0.0)
    py = py + hi - lo
    px = px - hi * w_f + lo * w_f

    # --- per-gaussian rows (lane-dense, broadcast over pixels) ----------
    mx = g_ref[0:1, :]     # (1, TN)
    my = g_ref[1:2, :]
    a = g_ref[2:3, :]      # -0.5*log2(e)*conic00
    b = g_ref[3:4, :]      # -0.5*log2(e)*conic11
    c = g_ref[4:5, :]      # -0.5*log2(e)*(conic01+conic10)
    lop = g_ref[5:6, :]    # log2(sigmoid(opacity)); -1e30 for padded columns

    dx0 = px - mx          # (TP, TN)
    dx1 = py - my
    # Horner form; opacity folded into the exponent -> single exp2, no post-mul.
    q = dx0 * (a * dx0 + c * dx1) + b * (dx1 * dx1) + lop
    # alpha_clip = -relu(-alpha + 0.99) + 0.99  ==  min(alpha, 0.99)
    out_ref[...] = jnp.minimum(jnp.exp2(q), 0.99).astype(out_ref.dtype)


def rasterize_alpha(width, height, means2d, conic00, conic01, conic10, conic11,
                    opacity_logit, *, tile_p=2048, tile_n=1024,
                    out_dtype=jnp.float32):
    """Returns the (P = H*W, N) clipped alpha slab."""
    width = int(width)
    height = int(height)
    P = width * height
    N = means2d.shape[0]
    assert P < (1 << 24), "in-kernel f32 pixel-index math requires P < 2^24"

    # ---- tile selection --------------------------------------------------
    # Pixel axis: biggest tile (amortizes ~0.35us per-grid-step overhead).
    tile_p_eff = _round_up(min(int(tile_p), _round_up(P, 8)), 8)
    p_pad = _round_up(P, tile_p_eff)

    # Gaussian axis: candidate tile minimizing padding waste (padding is pure
    # loss in compute + HBM writeback); prefer the larger tile on ties.
    n128 = _round_up(N, 128)
    cap = min(_round_up(max(int(tile_n), 128), 128), n128)
    cands = sorted(set([t for t in (1024, 512, 256, 128) if t <= cap] + [cap]))
    n_pad, neg_t = min((_round_up(N, t), -t) for t in cands)
    tile_n_eff = -neg_t

    # ---- host-side folding of per-gaussian constants (O(N) work) ---------
    a2 = (-0.5 * _LOG2E) * conic00
    b2 = (-0.5 * _LOG2E) * conic11
    c2 = (-0.5 * _LOG2E) * (conic01 + conic10)
    lop = jax.nn.log_sigmoid(opacity_logit) * _LOG2E      # log2(sigmoid(op))
    rows = jnp.stack([means2d[:, 0], means2d[:, 1], a2, b2, c2, lop],
                     axis=0).astype(jnp.float32)          # (6, N)
    gauss = jnp.zeros((8, n_pad), jnp.float32)
    gauss = gauss.at[5, :].set(-1e30)                     # padded cols -> alpha=0
    gauss = gauss.at[:6, :N].set(rows)

    grid = (p_pad // tile_p_eff, n_pad // tile_n_eff)

    itemsize = jnp.dtype(out_dtype).itemsize
    out_block_bytes = tile_p_eff * tile_n_eff * itemsize
    in_block_bytes = 8 * tile_n_eff * 4
    vmem_limit = 2 * (out_block_bytes + in_block_bytes) + (4 << 20)
    vmem_limit = int(min(max(vmem_limit, 32 << 20), 60 << 20))  # v7x-safe

    elems = p_pad * n_pad
    cost = pl.CostEstimate(
        flops=10 * elems,
        transcendentals=elems,
        bytes_accessed=elems * itemsize + 8 * n_pad * 4,
    )

    kernel = functools.partial(_rasterize_alpha_kernel,
                               tile_p=tile_p_eff, width=width)

    out = pl.pallas_call(
        kernel,
        out_shape=jax.ShapeDtypeStruct((p_pad, n_pad), out_dtype),
        grid_spec=pltpu.PrefetchScalarGridSpec(
            num_scalar_prefetch=0,
            grid=grid,
            in_specs=[pl.BlockSpec((8, tile_n_eff), lambda i, j: (0, j))],
            out_specs=pl.BlockSpec((tile_p_eff, tile_n_eff),
                                   lambda i, j: (i, j)),
        ),
        compiler_params=pltpu.CompilerParams(
            dimension_semantics=("parallel", "parallel"),
            vmem_limit_bytes=vmem_limit),
        cost_estimate=cost,
    )(gauss)

    if p_pad != P or n_pad != N:
        out = out[:P, :N]
    return out


# ----------------------------------------------------------------------------
# JAX glue reproducing the PyTorch module semantics
# ----------------------------------------------------------------------------
def get_viewmat(c2w):
    """c2w: (B, 3, 4) -> world2camera (B, 4, 4), matching the torch helper."""
    R = c2w[:, :3, :3] * jnp.array([[[1.0, -1.0, -1.0]]], dtype=c2w.dtype)
    T = c2w[:, :3, 3:4]
    R_inv = jnp.swapaxes(R, 1, 2)
    T_inv = -jnp.matmul(R_inv, T)
    B = c2w.shape[0]
    viewmat = jnp.zeros((B, 4, 4), dtype=c2w.dtype)
    viewmat = viewmat.at[:, 3, 3].set(1.0)
    viewmat = viewmat.at[:, :3, :3].set(R_inv)
    viewmat = viewmat.at[:, :3, 3:4].set(T_inv)
    return viewmat


def quaternion_to_rotation_matrix(quats):
    quats = quats / jnp.linalg.norm(quats, axis=1, keepdims=True)
    w, x, y, z = quats[:, 0], quats[:, 1], quats[:, 2], quats[:, 3]
    R = jnp.stack([
        1 - 2 * (y ** 2 + z ** 2), 2 * (x * y - z * w), 2 * (x * z + y * w),
        2 * (x * y + z * w), 1 - 2 * (x ** 2 + z ** 2), 2 * (y * z - x * w),
        2 * (x * z - y * w), 2 * (y * z + x * w), 1 - 2 * (x ** 2 + y ** 2),
    ], axis=-1).reshape(-1, 3, 3)
    return R


class RasterizationModelRGBNotile:
    """JAX/Pallas port of the forward() of the PyTorch module.

    Instead of loading a nerfstudio checkpoint, the gaussian parameters
    (means, quats, scales(log), opacities(logit)) are passed in directly.
    """

    def __init__(self, means, quats, scales, opacities, *, fx, fy, width, height):
        self.fx = float(fx)
        self.fy = float(fy)
        self.width = int(width)
        self.height = int(height)

        N = means.shape[0]
        self.N = N
        ones = jnp.ones((N, 1), means.dtype)
        means_hom = jnp.concatenate([means, ones], axis=1)[None]        # (1, N, 4)
        self.means_hom_tmp = jnp.swapaxes(means_hom, 1, 2)              # (1, 4, N)

        R_g = quaternion_to_rotation_matrix(quats)                      # (N, 3, 3)
        scales_matrix = jax.vmap(jnp.diag)(jnp.exp(scales))             # (N, 3, 3)
        M = jnp.matmul(R_g, scales_matrix)
        self.cov_world = jnp.matmul(M, jnp.swapaxes(M, 1, 2))[None]     # (1, N, 3, 3)

        self.K = jnp.array([[[self.fx, 0.0, self.width / 2.0],
                             [0.0, self.fy, self.height / 2.0],
                             [0.0, 0.0, 1.0]]], dtype=jnp.float32)      # (1, 3, 3)
        self.opacities_logit = opacities.reshape(-1)                    # (N,)
        self.opacities_rast = jax.nn.sigmoid(opacities)[None, None]     # (1, 1, N, 1)

        # Pixel grid kept only for the pure-jnp reference (the Pallas kernel
        # generates pixel coordinates in-kernel).
        xs = jnp.arange(self.width)
        ys = jnp.arange(self.height)
        gx, gy = jnp.meshgrid(xs, ys, indexing="xy")                    # (H, W)
        pix_coord = jnp.stack([gx, gy], axis=-1).reshape(-1, 2)         # (H*W, 2)
        self.tile_coord = pix_coord.astype(jnp.float32)[None, :, None, :]

    # per-gaussian preprocessing (matches the PyTorch forward glue exactly)
    def _per_gaussian(self, x):
        means_cam_hom = jnp.swapaxes(jnp.matmul(x, self.means_hom_tmp), 1, 2)
        means_cam = means_cam_hom[:, :, :3] / means_cam_hom[:, :, 3:4]
        R_cam = x[:, :3, :3]
        cov_temp = jnp.matmul(R_cam[:, None], self.cov_world)
        cov_cam = jnp.matmul(cov_temp, jnp.swapaxes(R_cam, -1, -2)[:, None])
        means_proj_hom = jnp.swapaxes(
            jnp.matmul(self.K, jnp.swapaxes(means_cam, 1, 2)), 2, 1)
        means2D = means_proj_hom[:, :, :2] / means_proj_hom[:, :, 2:3]

        xg = means_cam[:, :, 0]
        yg = means_cam[:, :, 1]
        zc = means_cam[:, :, 2]
        J00 = self.fx / zc
        J02 = -self.fx * xg / zc ** 2
        J11 = self.fy / zc
        J12 = -self.fy * yg / zc ** 2
        cov2D00 = (J00 * J00 * cov_cam[:, :, 0, 0] + J00 * J02 * cov_cam[:, :, 0, 2]
                   + J02 * J00 * cov_cam[:, :, 2, 0] + J02 * J02 * cov_cam[:, :, 2, 2]) + 0.3
        cov2D11 = (J11 * J11 * cov_cam[:, :, 1, 1] + J11 * J12 * cov_cam[:, :, 1, 2]
                   + J12 * J11 * cov_cam[:, :, 2, 1] + J12 * J12 * cov_cam[:, :, 2, 2]) + 0.3
        cov2D01 = (J00 * J11 * cov_cam[:, :, 0, 1] + J00 * J12 * cov_cam[:, :, 0, 2]
                   + J02 * J11 * cov_cam[:, :, 2, 1] + J02 * J12 * cov_cam[:, :, 2, 2])
        cov2D10 = (J11 * J00 * cov_cam[:, :, 1, 0] + J11 * J02 * cov_cam[:, :, 1, 2]
                   + J12 * J00 * cov_cam[:, :, 2, 0] + J12 * J02 * cov_cam[:, :, 2, 2])
        det = cov2D00 * cov2D11 - cov2D01 * cov2D10
        conic00 = cov2D11 / det
        conic01 = -cov2D01 / det
        conic10 = -cov2D10 / det
        conic11 = cov2D00 / det
        return means2D, conic00, conic01, conic10, conic11

    def forward(self, x):
        """x: (1, 4, 4) world->camera matrix; returns (1, H*W, N, 1) alpha_clip."""
        assert x.shape[0] == 1  # torch.bmm with batch-1 means_hom_tmp forces B == 1
        means2D, c00, c01, c10, c11 = self._per_gaussian(x)
        alpha = rasterize_alpha(self.width, self.height, means2D[0],
                                c00[0], c01[0], c10[0], c11[0],
                                self.opacities_logit)                   # (P, N)
        return alpha[None, :, :, None]

    # pure-jnp reference (mirrors the PyTorch code one-to-one) for checking
    def forward_reference(self, x):
        means2D, c00, c01, c10, c11 = self._per_gaussian(x)
        dx = self.tile_coord - means2D[:, None, :]                      # (1, P, N, 2)
        gauss_weight = jnp.exp(-0.5 * (dx[:, :, :, 0] ** 2 * c00
                                       + dx[:, :, :, 1] ** 2 * c11
                                       + dx[:, :, :, 0] * dx[:, :, :, 1] * c01
                                       + dx[:, :, :, 0] * dx[:, :, :, 1] * c10))
        alpha = gauss_weight[:, :, :, None] * self.opacities_rast
        return -jax.nn.relu(-alpha + 0.99) + 0.99


# ----------------------------------------------------------------------------
# Demo / self-test
# ----------------------------------------------------------------------------
if __name__ == "__main__":
    key = jax.random.PRNGKey(0)
    k1, k2, k3, k4 = jax.random.split(key, 4)

    # Small synthetic scene (the real module loads these from a checkpoint).
    N = 128          # number of gaussians
    W = H = 16       # small image -> P = H*W = 256 pixels
    fx = fy = 20.0

    means = jax.random.uniform(k1, (N, 3), jnp.float32, -1.0, 1.0)
    quats = jax.random.normal(k2, (N, 4), jnp.float32)
    scales = jax.random.uniform(k3, (N, 3), jnp.float32, -3.0, -2.0)   # log-scales
    opacities = jax.random.normal(k4, (N, 1), jnp.float32)             # logit-opacity

    model = RasterizationModelRGBNotile(means, quats, scales, opacities,
                                        fx=fx, fy=fy, width=W, height=H)

    # Build the forward input x: a (1, 4, 4) world->camera matrix, exactly the
    # quantity get_viewmat() produces from a camera_to_world pose.
    ang = 0.1
    Rw = jnp.array([[jnp.cos(ang), 0.0, jnp.sin(ang)],
                    [0.0, 1.0, 0.0],
                    [-jnp.sin(ang), 0.0, jnp.cos(ang)]], dtype=jnp.float32)
    Tw = jnp.array([0.1, -0.05, 2.5], dtype=jnp.float32)
    c2w = jnp.concatenate([Rw, Tw[:, None]], axis=1)[None]             # (1, 3, 4)
    x = get_viewmat(c2w)                                               # (1, 4, 4)

    out = model.forward(x)
    out = jax.block_until_ready(out)
    assert out.shape == (1, W * H, N, 1), out.shape

    ref = jax.block_until_ready(model.forward_reference(x))
    # Folded constants (log2(e), log-sigmoid opacity) and exp2 change rounding
    # slightly vs the literal reference expression -> 5e-4 tolerance.
    assert jnp.allclose(out, ref, rtol=5e-4, atol=5e-4), (
        float(jnp.max(jnp.abs(out - ref))))

    print("KERNEL_OK")
</pallas_src>

<mosaic_0001>
module attributes {stable_mosaic.version = 11 : i64} {
  func.func @_rasterize_alpha_kernel(%arg0: i32, %arg1: i32, %arg2: memref<8x128xf32, #tpu.memory_space<vmem>>, %arg3: memref<256x128xf32, #tpu.memory_space<vmem>>) attributes {dimension_semantics = [#tpu.dimension_semantics<parallel>, #tpu.dimension_semantics<parallel>], iteration_bounds = array<i64: 1, 1>, scalar_prefetch = 0 : i64, scratch_operands = 0 : i64, tpu.core_type = #tpu.core_type<tc>, window_params = [{transform_indices = @transform_0, window_bounds = array<i64: 8, 128>}, {transform_indices = @transform_1, window_bounds = array<i64: 256, 128>}]} {
    %0 = tpu.iota {dimensions = array<i32: 0>} : vector<256x1xi32>
    %c256_i32 = arith.constant 256 : i32
    %1 = arith.muli %arg0, %c256_i32 : i32
    %2 = vector.broadcast %1 : i32 to vector<256x1xi32>
    %3 = arith.addi %0, %2 : vector<256x1xi32>
    %4 = arith.sitofp %3 : vector<256x1xi32> to vector<256x1xf32>
    %cst = arith.constant 6.250000e-02 : f32
    %5 = vector.broadcast %cst : f32 to vector<256x1xf32>
    %6 = arith.mulf %4, %5 : vector<256x1xf32>
    %7 = math.floor %6 : vector<256x1xf32>
    %cst_0 = arith.constant 1.600000e+01 : f32
    %8 = vector.broadcast %cst_0 : f32 to vector<256x1xf32>
    %9 = arith.mulf %7, %8 : vector<256x1xf32>
    %10 = arith.subf %4, %9 : vector<256x1xf32>
    %cst_1 = arith.constant 1.600000e+01 : f32
    %11 = vector.broadcast %cst_1 : f32 to vector<256x1xf32>
    %12 = arith.cmpf oge, %10, %11 : vector<256x1xf32>
    %cst_2 = arith.constant 1.000000e+00 : f32
    %cst_3 = arith.constant 0.000000e+00 : f32
    %13 = vector.broadcast %cst_2 : f32 to vector<256x1xf32>
    %14 = vector.broadcast %cst_3 : f32 to vector<256x1xf32>
    %15 = arith.select %12, %13, %14 : vector<256x1xi1>, vector<256x1xf32>
    %cst_4 = arith.constant 0.000000e+00 : f32
    %16 = vector.broadcast %cst_4 : f32 to vector<256x1xf32>
    %17 = arith.cmpf olt, %10, %16 : vector<256x1xf32>
    %cst_5 = arith.constant 1.000000e+00 : f32
    %cst_6 = arith.constant 0.000000e+00 : f32
    %18 = vector.broadcast %cst_5 : f32 to vector<256x1xf32>
    %19 = vector.broadcast %cst_6 : f32 to vector<256x1xf32>
    %20 = arith.select %17, %18, %19 : vector<256x1xi1>, vector<256x1xf32>
    %21 = arith.addf %7, %15 : vector<256x1xf32>
    %22 = arith.subf %21, %20 : vector<256x1xf32>
    %cst_7 = arith.constant 1.600000e+01 : f32
    %23 = vector.broadcast %cst_7 : f32 to vector<256x1xf32>
    %24 = arith.mulf %15, %23 : vector<256x1xf32>
    %25 = arith.subf %10, %24 : vector<256x1xf32>
    %cst_8 = arith.constant 1.600000e+01 : f32
    %26 = vector.broadcast %cst_8 : f32 to vector<256x1xf32>
    %27 = arith.mulf %20, %26 : vector<256x1xf32>
    %28 = arith.addf %25, %27 : vector<256x1xf32>
    %c0 = arith.constant 0 : index
    %c0_9 = arith.constant 0 : index
    %29 = vector.load %arg2[%c0, %c0_9] : memref<8x128xf32, #tpu.memory_space<vmem>>, vector<1x128xf32>
    %c1 = arith.constant 1 : index
    %c0_10 = arith.constant 0 : index
    %30 = vector.load %arg2[%c1, %c0_10] : memref<8x128xf32, #tpu.memory_space<vmem>>, vector<1x128xf32>
    %c2 = arith.constant 2 : index
    %c0_11 = arith.constant 0 : index
    %31 = vector.load %arg2[%c2, %c0_11] : memref<8x128xf32, #tpu.memory_space<vmem>>, vector<1x128xf32>
    %c3 = arith.constant 3 : index
    %c0_12 = arith.constant 0 : index
    %32 = vector.load %arg2[%c3, %c0_12] : memref<8x128xf32, #tpu.memory_space<vmem>>, vector<1x128xf32>
    %c4 = arith.constant 4 : index
    %c0_13 = arith.constant 0 : index
    %33 = vector.load %arg2[%c4, %c0_13] : memref<8x128xf32, #tpu.memory_space<vmem>>, vector<1x128xf32>
    %c5 = arith.constant 5 : index
    %c0_14 = arith.constant 0 : index
    %34 = vector.load %arg2[%c5, %c0_14] : memref<8x128xf32, #tpu.memory_space<vmem>>, vector<1x128xf32>
    %35 = vector.broadcast %28 : vector<256x1xf32> to vector<256x128xf32>
    %36 = vector.broadcast %29 : vector<1x128xf32> to vector<256x128xf32>
    %37 = arith.subf %35, %36 : vector<256x128xf32>
    %38 = vector.broadcast %22 : vector<256x1xf32> to vector<256x128xf32>
    %39 = vector.broadcast %30 : vector<1x128xf32> to vector<256x128xf32>
    %40 = arith.subf %38, %39 : vector<256x128xf32>
    %41 = vector.broadcast %31 : vector<1x128xf32> to vector<256x128xf32>
    %42 = arith.mulf %41, %37 : vector<256x128xf32>
    %43 = vector.broadcast %33 : vector<1x128xf32> to vector<256x128xf32>
    %44 = arith.mulf %43, %40 : vector<256x128xf32>
    %45 = arith.addf %42, %44 : vector<256x128xf32>
    %46 = arith.mulf %37, %45 : vector<256x128xf32>
    %47 = arith.mulf %40, %40 : vector<256x128xf32>
    %48 = vector.broadcast %32 : vector<1x128xf32> to vector<256x128xf32>
    %49 = arith.mulf %48, %47 : vector<256x128xf32>
    %50 = arith.addf %46, %49 : vector<256x128xf32>
    %51 = vector.broadcast %34 : vector<1x128xf32> to vector<256x128xf32>
    %52 = arith.addf %50, %51 : vector<256x128xf32>
    %53 = math.exp2 %52 : vector<256x128xf32>
    %cst_15 = arith.constant 9.900000e-01 : f32
    %54 = vector.broadcast %cst_15 : f32 to vector<256x128xf32>
    %55 = arith.minimumf %53, %54 : vector<256x128xf32>
    %c0_16 = arith.constant 0 : index
    %c0_17 = arith.constant 0 : index
    %56 = vector.load %arg3[%c0_16, %c0_17] : memref<256x128xf32, #tpu.memory_space<vmem>>, vector<256x128xf32>
    tpu.vector_store %arg3[%c0_16, %c0_17], %55 {strides = array<i32>} : memref<256x128xf32, #tpu.memory_space<vmem>>, vector<256x128xf32>,
    return
  }
  func.func @transform_0(%arg0: i32, %arg1: i32) -> (i32, i32) {
    %c0_i32 = arith.constant 0 : i32
    %c0_i32_0 = arith.constant 0 : i32
    return %c0_i32, %arg1 : i32, i32
  }
  func.func @transform_1(%arg0: i32, %arg1: i32) -> (i32, i32) {
    %c0_i32 = arith.constant 0 : i32
    return %arg0, %arg1 : i32, i32
  }
}

</mosaic_0001>

<bundles_post_ra>
// kernel: tpu_custom_call.1
= control target key start
LH: loop header
LB: loop body
LE: loop exit
PB: predicated region body
PF: predicated region fallthrough
CT: control target
= control target key end

     0   :  { %6 = vsyncpa [#allocation3], 0  ;;  %s1642_s0 = inlined_call_operand.hbm [shape: f32[8,128], index: 0, kind: input, shape index: {}]   ;;  %s1643_s1 = inlined_call_operand.hbm [shape: f32[256,128], index: 1, kind: output, shape index: {}]  }
   0x1   :  { %7 = vsyncpa [#allocation4], 0  ;;  %s1156_s6 = smov [#allocation2]  }
   0x2   :  { %s14_s7 = sshll.u32 %s1156_s6, 4  ;;  %s15_s7 = int_to_ptr.vmem [resolvable:$true] %s14_s7 }
   0x3   :  { %s1120_s8 = scalar_lea.vmem %s15_s7, 128  ;;  %p1125_p1 = scmp.lt.s32.totalorder %s15_s7, %s15_s7 }
   0x4   :  { %p1121_p0 = scmp.ne.s32.totalorder %s15_s7, %s1120_s8  ;;  %p1126_p2 = scmp.lt.s32.totalorder %s1120_s8, %s1120_s8 }
   0x6   :  { %p1127_p3 = por %p1126_p2, %p1125_p1 }
   0x8   :  { %p1128_p4 = pnand %p1127_p3, %p1121_p0 }
   0xa   :  { %1131 = shalt.err (!%p1128_p4)
}
   0xb   :  { %17 = dma.hbm_to_vmem [thread:$0]  %s1642_s0, 128, %s15_s7, [#allocation3]  }
   0xc   :  { %1152 = dma.done.wait [#allocation3], 128  }
   0xd   :  { %1153 = vsyncadd [#allocation3], 4294967168  ;;  %v21_v0 = vlaneseq  ;;  %v1157_v41 = vmov 0.0   ;;  %v1237_v50 = vld [vmem:[#allocation2 + $0x1] ss:$0 sm:$0xff]  ;;  %s1158_s0 = smov [#allocation5]  }
   0xe   :  { %v1239_v53 = vld [vmem:[#allocation2] ss:$0 sm:$0xff]  ;;  %v1243_v56 = vld [vmem:[#allocation2 + $0x4] ss:$0 sm:$0xff]  ;;  %s1019_s11 = sshll.u32 %s1158_s0, 4  ;;  %s1020_s11 = int_to_ptr.vmem [resolvable:$true] %s1019_s11 }
   0xf   :  { %v1174_v1 = vshrl.u32 %v21_v0, 7  ;;  %s1132_s12 = scalar_lea.vmem %s1020_s11, 4096  ;;  %p1137_p6 = scmp.lt.s32.totalorder %s1020_s11, %s1020_s11 }
  0x10   :  { %p1133_p5 = scmp.ne.s32.totalorder %s1020_s11, %s1132_s12  ;;  %p1138_p7 = scmp.lt.s32.totalorder %s1132_s12, %s1132_s12 }
  0x11   :  { %v88_v2 = vcvt.s32.f32 %v1174_v1  ;;  %v23_v3 = vadd.s32 8, %v1174_v1  ;;  %v24_v4 = vadd.s32 16, %v1174_v1  ;;  %v25_v5 = vadd.s32 24, %v1174_v1 }
  0x12   :  { %v1181_v6 = vadd.s32 32, %v1174_v1  ;;  %v1184_v7 = vadd.s32 40, %v1174_v1  ;;  %v1187_v8 = vadd.s32 48, %v1174_v1  ;;  %v1190_v9 = vadd.s32 56, %v1174_v1  ;;  %p1139_p8 = por %p1138_p7, %p1137_p6 }
  0x13   :  { %v120_v10 = vmul.f32 0.0625, %v88_v2  ;;  %v89_v11 = vcvt.s32.f32 %v23_v3  ;;  %v90_v12 = vcvt.s32.f32 %v24_v4  ;;  %v91_v13 = vcvt.s32.f32 %v25_v5  ;;  %v1250_v3 = vld [vmem:[#allocation2 + $0x3] ss:$0 sm:$0xff] }
  0x14   :  { %v92_v14 = vcvt.s32.f32 %v1181_v6  ;;  %v93_v15 = vcvt.s32.f32 %v1184_v7  ;;  %v94_v16 = vcvt.s32.f32 %v1187_v8  ;;  %v95_v17 = vcvt.s32.f32 %v1190_v9  ;;  %p1140_p9 = pnand %p1139_p8, %p1133_p5 }
  0x15   :  { %v152_v18 = vfloor.f32 %v120_v10  ;;  %v121_v19 = vmul.f32 0.0625, %v89_v11  ;;  %v122_v20 = vmul.f32 0.0625, %v90_v12  ;;  %v1196_v21 = vmul.f32 0.0625, %v91_v13 }
  0x16   :  { %v1200_v22 = vmul.f32 0.0625, %v92_v14  ;;  %v1204_v24 = vmul.f32 0.0625, %v93_v15  ;;  %v1208_v25 = vmul.f32 0.0625, %v94_v16  ;;  %v1212_v26 = vmul.f32 0.0625, %v95_v17 }
  0x17   :  { %v184_v23 = vmul.f32 16.0, %v152_v18  ;;  %v153_v27 = vfloor.f32 %v121_v19  ;;  %v154_v28 = vfloor.f32 %v122_v20  ;;  %v155_v29 = vfloor.f32 %v1196_v21 }
  0x18   :  { %v156_v30 = vfloor.f32 %v1200_v22  ;;  %v157_v32 = vfloor.f32 %v1204_v24  ;;  %v158_v33 = vfloor.f32 %v1208_v25  ;;  %v159_v34 = vfloor.f32 %v1212_v26 }
  0x19   :  { %v216_v31 = vsub.f32 %v88_v2, %v184_v23  ;;  %v185_v35 = vmul.f32 16.0, %v153_v27  ;;  %v186_v36 = vmul.f32 16.0, %v154_v28  ;;  %v187_v37 = vmul.f32 16.0, %v155_v29  ;;  %v1248_v2 = vld [vmem:[#allocation2 + $0x2] ss:$0 sm:$0xff] }
  0x1a   :  { %v1223_v38 = vmul.f32 16.0, %v156_v30  ;;  %v1227_v39 = vmul.f32 16.0, %v157_v32  ;;  %v1231_v40 = vmul.f32 16.0, %v158_v33 }
  0x1b   :  { %vm248_vm0 = vcmp.ge.f32.partialorder %v216_v31, 16.0  ;;  %vm312_vm1 = vcmp.lt.f32.partialorder %v216_v31, 0.0  ;;  %v217_v44 = vsub.f32 %v89_v11, %v185_v35  ;;  %v218_v45 = vsub.f32 %v90_v12, %v186_v36 }
  0x1c   :  { %v280_v42 = vsel %vm248_vm0, 1.0, %v1157_v41  ;;  %v344_v43 = vsel %vm312_vm1, 1.0, %v1157_v41  ;;  %v1235_v49 = vsub.f32 %v91_v13, %v187_v37  ;;  %v221_v21 = vsub.f32 %v93_v15, %v1227_v39 }
  0x1d   :  { %v376_v46 = vadd.f32 %v280_v42, %v152_v18  ;;  %v440_v47 = vmul.f32 16.0, %v280_v42  ;;  %v504_v48 = vmul.f32 16.0, %v344_v43  ;;  %vm249_vm2 = vcmp.ge.f32.partialorder %v217_v44, 16.0 }
  0x1e   :  { %vm313_vm3 = vcmp.lt.f32.partialorder %v217_v44, 0.0  ;;  %vm250_vm4 = vcmp.ge.f32.partialorder %v218_v45, 16.0  ;;  %vm314_vm5 = vcmp.lt.f32.partialorder %v218_v45, 0.0  ;;  %v281_v54 = vsel %vm249_vm2, 1.0, %v1157_v41 }
  0x1f   :  { %v408_v51 = vsub.f32 %v376_v46, %v344_v43  ;;  %v472_v52 = vsub.f32 %v216_v31, %v440_v47  ;;  %v345_v55 = vsel %vm313_vm3, 1.0, %v1157_v41  ;;  %v377_v57 = vadd.f32 %v281_v54, %v153_v27 }
  0x20   :  { %v441_v58 = vmul.f32 16.0, %v281_v54  ;;  %v505_v59 = vmul.f32 16.0, %v345_v55  ;;  %v282_v60 = vsel %vm250_vm4, 1.0, %v1157_v41  ;;  %v346_v63 = vsel %vm314_vm5, 1.0, %v1157_v41 }
  0x21   :  { %v536_v61 = vadd.f32 %v504_v48, %v472_v52  ;;  %v614_v62 = vsub.f32 %v408_v51, %v1237_v50  ;;  %v378_v0 = vadd.f32 %v282_v60, %v154_v28  ;;  %v409_v4 = vsub.f32 %v377_v57, %v345_v55 }
  0x22   :  { %v473_v5 = vsub.f32 %v217_v44, %v441_v58  ;;  %v442_v10 = vmul.f32 16.0, %v282_v60  ;;  %v506_v11 = vmul.f32 16.0, %v346_v63  ;;  %vm251_vm6 = vcmp.ge.f32.partialorder %v1235_v49, 16.0  ;;  %v1271_v60 = vld [vmem:[#allocation2 + $0x5] ss:$0 sm:$0xff] }
  0x23   :  { %v578_v12 = vsub.f32 %v536_v61, %v1239_v53  ;;  %v686_v13 = vmul.f32 %v1243_v56, %v614_v62  ;;  %v782_v18 = vmul.f32 %v614_v62, %v614_v62  ;;  %v410_v19 = vsub.f32 %v378_v0, %v346_v63 }
  0x24   :  { %v537_v20 = vadd.f32 %v505_v59, %v473_v5  ;;  %v615_v23 = vsub.f32 %v409_v4, %v1237_v50  ;;  %v474_v27 = vsub.f32 %v218_v45, %v442_v10  ;;  %v283_v36 = vsel %vm251_vm6, 1.0, %v1157_v41 }
  0x25   :  { %v650_v28 = vmul.f32 %v1248_v2, %v578_v12  ;;  %v818_v31 = vmul.f32 %v1250_v3, %v782_v18  ;;  %v616_v35 = vsub.f32 %v410_v19, %v1237_v50  ;;  %vm315_vm7 = vcmp.lt.f32.partialorder %v1235_v49, 0.0 }
  0x26   :  { %v579_v37 = vsub.f32 %v537_v20, %v1239_v53  ;;  %v687_v42 = vmul.f32 %v1243_v56, %v615_v23  ;;  %v783_v43 = vmul.f32 %v615_v23, %v615_v23  ;;  %v538_v44 = vadd.f32 %v506_v11, %v474_v27 }
  0x27   :  { %v718_v46 = vadd.f32 %v686_v13, %v650_v28  ;;  %v688_v47 = vmul.f32 %v1243_v56, %v616_v35  ;;  %v784_v45 = vmul.f32 %v616_v35, %v616_v35  ;;  %v347_v54 = vsel %vm315_vm7, 1.0, %v1157_v41 }
  0x28   :  { %v651_v48 = vmul.f32 %v1248_v2, %v579_v37  ;;  %v819_v51 = vmul.f32 %v1250_v3, %v783_v43  ;;  %v580_v52 = vsub.f32 %v538_v44, %v1239_v53  ;;  %v379_v58 = vadd.f32 %v283_v36, %v155_v29 }
  0x29   :  { %v750_v55 = vmul.f32 %v718_v46, %v578_v12  ;;  %v820_v57 = vmul.f32 %v1250_v3, %v784_v45  ;;  %v443_v59 = vmul.f32 16.0, %v283_v36  ;;  %v507_v63 = vmul.f32 16.0, %v347_v54 }
  0x2a   :  { %v719_v61 = vadd.f32 %v687_v42, %v651_v48  ;;  %v652_v62 = vmul.f32 %v1248_v2, %v580_v52  ;;  %v220_v0 = vsub.f32 %v92_v14, %v1223_v38  ;;  %v411_v5 = vsub.f32 %v379_v58, %v347_v54 }
  0x2b   :  { %v850_v4 = vadd.f32 %v818_v31, %v750_v55  ;;  %v475_v10 = vsub.f32 %v1235_v49, %v443_v59  ;;  %vm253_vm10 = vcmp.ge.f32.partialorder %v221_v21, 16.0  ;;  %vm317_vm11 = vcmp.lt.f32.partialorder %v221_v21, 0.0 }
  0x2c   :  { %v751_v29 = vmul.f32 %v719_v61, %v579_v37  ;;  %v720_v11 = vadd.f32 %v688_v47, %v652_v62  ;;  %vm252_vm8 = vcmp.ge.f32.partialorder %v220_v0, 16.0  ;;  %vm316_vm9 = vcmp.lt.f32.partialorder %v220_v0, 0.0 }
  0x2d   :  { %v886_v12 = vadd.f32 %v1271_v60, %v850_v4  ;;  %v539_v13 = vadd.f32 %v507_v63, %v475_v10  ;;  %v617_v18 = vsub.f32 %v411_v5, %v1237_v50  ;;  %v284_v6 = vsel %vm252_vm8, 1.0, %v1157_v41 }
  0x2e   :  { %v851_v14 = vadd.f32 %v819_v51, %v751_v29  ;;  %v752_v38 = vmul.f32 %v720_v11, %v580_v52  ;;  %v348_v19 = vsel %vm316_vm9, 1.0, %v1157_v41  ;;  %v380_v49 = vadd.f32 %v284_v6, %v156_v30 }
  0x2f   :  { %1042 = vpow2.f32 %v886_v12  ;;  %v581_v7 = vsub.f32 %v539_v13, %v1239_v53  ;;  %v689_v15 = vmul.f32 %v1243_v56, %v617_v18  ;;  %v785_v39 = vmul.f32 %v617_v18, %v617_v18 }
  0x30   :  { %v887_v20 = vadd.f32 %v1271_v60, %v851_v14  ;;  %v852_v23 = vadd.f32 %v820_v57, %v752_v38  ;;  %v412_v27 = vsub.f32 %v380_v49, %v348_v19  ;;  %v444_v28 = vmul.f32 16.0, %v284_v6 }
  0x31   :  { %v653_v31 = vmul.f32 %v1248_v2, %v581_v7  ;;  %v821_v35 = vmul.f32 %v1250_v3, %v785_v39  ;;  %v508_v36 = vmul.f32 16.0, %v348_v19  ;;  %v285_v43 = vsel %vm253_vm10, 1.0, %v1157_v41 }
  0x32   :  { %1044 = vpow2.f32 %v887_v20  ;;  %v888_v22 = vadd.f32 %v1271_v60, %v852_v23  ;;  %v476_v30 = vsub.f32 %v220_v0, %v444_v28  ;;  %v618_v37 = vsub.f32 %v412_v27, %v1237_v50 }
  0x33   :  { %v721_v42 = vadd.f32 %v689_v15, %v653_v31  ;;  %v222_v44 = vsub.f32 %v94_v16, %v1231_v40  ;;  %v349_v51 = vsel %vm317_vm11, 1.0, %v1157_v41  ;;  %v381_v52 = vadd.f32 %v285_v43, %v157_v32 }
  0x34   :  { %1046 = vpow2.f32 %v888_v22  ;;  %v540_v46 = vadd.f32 %v508_v36, %v476_v30  ;;  %v690_v47 = vmul.f32 %v1243_v56, %v618_v37  ;;  %v786_v45 = vmul.f32 %v618_v37, %v618_v37 }
  0x35   :  { %v753_v48 = vmul.f32 %v721_v42, %v581_v7  ;;  %v445_v54 = vmul.f32 16.0, %v285_v43  ;;  %v509_v58 = vmul.f32 16.0, %v349_v51  ;;  %vm254_vm12 = vcmp.ge.f32.partialorder %v222_v44, 16.0 }
  0x36   :  { %v582_v55 = vsub.f32 %v540_v46, %v1239_v53  ;;  %v822_v57 = vmul.f32 %v1250_v3, %v786_v45  ;;  %v413_v16 = vsub.f32 %v381_v52, %v349_v51  ;;  %v286_v59 = vsel %vm254_vm12, 1.0, %v1157_v41 }
  0x37   :  { %v853_v8 = vadd.f32 %v821_v35, %v753_v48  ;;  %v477_v40 = vsub.f32 %v221_v21, %v445_v54  ;;  %vm318_vm13 = vcmp.lt.f32.partialorder %v222_v44, 0.0  ;;  %v382_v62 = vadd.f32 %v286_v59, %v158_v33 }
  0x38   :  { %v654_v61 = vmul.f32 %v1248_v2, %v582_v55  ;;  %v446_v24 = vmul.f32 16.0, %v286_v59  ;;  %v619_v0 = vsub.f32 %v413_v16, %v1237_v50  ;;  %v350_v4 = vsel %vm318_vm13, 1.0, %v1157_v41 }
  0x39   :  { %v889_v32 = vadd.f32 %v1271_v60, %v853_v8  ;;  %v541_v63 = vadd.f32 %v509_v58, %v477_v40  ;;  %v414_v10 = vsub.f32 %v382_v62, %v350_v4  ;;  %v510_v21 = vmul.f32 16.0, %v350_v4 }
  0x3a   :  { %v722_v5 = vadd.f32 %v690_v47, %v654_v61  ;;  %v478_v29 = vsub.f32 %v222_v44, %v446_v24  ;;  %v691_v12 = vmul.f32 %v1243_v56, %v619_v0  ;;  %v787_v13 = vmul.f32 %v619_v0, %v619_v0 }
  0x3b   :  { %1048 = vpow2.f32 %v889_v32  ;;  %v583_v11 = vsub.f32 %v541_v63, %v1239_v53  ;;  %v620_v6 = vsub.f32 %v414_v10, %v1237_v50  ;;  %v191_v14 = vmul.f32 16.0, %v159_v34 }
  0x3c   :  { %v1043_v25 = vpop.eup %1042  ;;  %v754_v33 = vmul.f32 %v722_v5, %v582_v55  ;;  %v542_v18 = vadd.f32 %v510_v21, %v478_v29  ;;  %v823_v49 = vmul.f32 %v1250_v3, %v787_v13  ;;  %v30_v7 = vadd.s32 64, %v1174_v1 }
  0x3d   :  { %v950_v38 = vmin.f32 %v1043_v25, 0.99  ;;  %v655_v19 = vmul.f32 %v1248_v2, %v583_v11  ;;  %v692_v20 = vmul.f32 %v1243_v56, %v620_v6  ;;  %v788_v23 = vmul.f32 %v620_v6, %v620_v6 }
  0x3e   :  { %v854_v15 = vadd.f32 %v822_v57, %v754_v33  ;;  %v584_v39 = vsub.f32 %v542_v18, %v1239_v53  ;;  %v223_v31 = vsub.f32 %v95_v17, %v191_v14  ;;  %v96_v35 = vcvt.s32.f32 %v30_v7 }
  0x3f   :  { %v1045_v27 = vpop.eup %1044  ;;  %982 = vst [vmem:[#allocation5] sm:$0xff] %v950_v38  ;;  %v723_v28 = vadd.f32 %v691_v12, %v655_v19  ;;  %v31_v36 = vadd.s32 72, %v1174_v1  ;;  %v824_v42 = vmul.f32 %v1250_v3, %v788_v23  ;;  %v32_v59 = vadd.s32 80, %v1174_v1 }
  0x40   :  { %v951_v22 = vmin.f32 %v1045_v27, 0.99  ;;  %v890_v30 = vadd.f32 %v1271_v60, %v854_v15  ;;  %v656_v37 = vmul.f32 %v1248_v2, %v584_v39  ;;  %vm255_vm14 = vcmp.ge.f32.partialorder %v223_v31, 16.0 }
  0x41   :  { %v1047_v43 = vpop.eup %1046  ;;  %v755_v44 = vmul.f32 %v723_v28, %v583_v11  ;;  %vm319_vm15 = vcmp.lt.f32.partialorder %v223_v31, 0.0  ;;  %v128_v46 = vmul.f32 0.0625, %v96_v35  ;;  %v287_v17 = vsel %vm255_vm14, 1.0, %v1157_v41 }
  0x42   :  { %983 = vst [vmem:[#allocation5 + $0x8] sm:$0xff] %v951_v22  ;;  %v952_v47 = vmin.f32 %v1047_v43, 0.99  ;;  %1050 = vpow2.f32 %v890_v30  ;;  %v724_v9 = vadd.f32 %v692_v20, %v656_v37  ;;  %v351_v48 = vsel %vm319_vm15, 1.0, %v1157_v41 }
  0x43   :  { %v855_v45 = vadd.f32 %v823_v49, %v755_v44  ;;  %v383_v51 = vadd.f32 %v287_v17, %v159_v34  ;;  %v447_v52 = vmul.f32 16.0, %v287_v17  ;;  %v511_v55 = vmul.f32 16.0, %v351_v48 }
  0x44   :  { %984 = vst [vmem:[#allocation5 + $0x10] sm:$0xff] %v952_v47  ;;  %v756_v54 = vmul.f32 %v724_v9, %v584_v39  ;;  %v160_v57 = vfloor.f32 %v128_v46  ;;  %v97_v58 = vcvt.s32.f32 %v31_v36  ;;  %v1334_v32 = vadd.s32 88, %v1174_v1 }
  0x45   :  { %v891_v8 = vadd.f32 %v1271_v60, %v855_v45  ;;  %v415_v16 = vsub.f32 %v383_v51, %v351_v48  ;;  %v479_v40 = vsub.f32 %v223_v31, %v447_v52  ;;  %v98_v63 = vcvt.s32.f32 %v32_v59 }
  0x46   :  { %v856_v61 = vadd.f32 %v824_v42, %v756_v54  ;;  %v192_v62 = vmul.f32 16.0, %v160_v57  ;;  %v129_v24 = vmul.f32 0.0625, %v97_v58  ;;  %v99_v29 = vcvt.s32.f32 %v1334_v32 }
  0x47   :  { %1052 = vpow2.f32 %v891_v8  ;;  %v543_v26 = vadd.f32 %v511_v55, %v479_v40  ;;  %v621_v34 = vsub.f32 %v415_v16, %v1237_v50  ;;  %v130_v39 = vmul.f32 0.0625, %v98_v63 }
  0x48   :  { %v1049_v0 = vpop.eup %1048  ;;  %v892_v4 = vadd.f32 %v1271_v60, %v856_v61  ;;  %v224_v5 = vsub.f32 %v96_v35, %v192_v62  ;;  %v161_v10 = vfloor.f32 %v129_v24  ;;  %v1347_v20 = vmul.f32 0.0625, %v99_v29 }
  0x49   :  { %v953_v21 = vmin.f32 %v1049_v0, 0.99  ;;  %v585_v11 = vsub.f32 %v543_v26, %v1239_v53  ;;  %v693_v12 = vmul.f32 %v1243_v56, %v621_v34  ;;  %v789_v13 = vmul.f32 %v621_v34, %v621_v34 }
  0x4a   :  { %1054 = vpow2.f32 %v892_v4  ;;  %vm256_vm0 = vcmp.ge.f32.partialorder %v224_v5, 16.0  ;;  %vm320_vm1 = vcmp.lt.f32.partialorder %v224_v5, 0.0  ;;  %v193_v25 = vmul.f32 16.0, %v161_v10 }
  0x4b   :  { %985 = vst [vmem:[#allocation5 + $0x18] sm:$0xff] %v953_v21  ;;  %v657_v33 = vmul.f32 %v1248_v2, %v585_v11  ;;  %v825_v18 = vmul.f32 %v1250_v3, %v789_v13  ;;  %v288_v6 = vsel %vm256_vm0, 1.0, %v1157_v41  ;;  %v352_v14 = vsel %vm320_vm1, 1.0, %v1157_v41 }
  0x4c   :  { %v384_v38 = vadd.f32 %v288_v6, %v160_v57  ;;  %v448_v19 = vmul.f32 16.0, %v288_v6  ;;  %v512_v49 = vmul.f32 16.0, %v352_v14  ;;  %v225_v7 = vsub.f32 %v97_v58, %v193_v25 }
  0x4d   :  { %v725_v15 = vadd.f32 %v693_v12, %v657_v33  ;;  %v1350_v23 = vadd.s32 96, %v1174_v1  ;;  %v162_v30 = vfloor.f32 %v130_v39  ;;  %v163_v58 = vfloor.f32 %v1347_v20 }
  0x4e   :  { %v416_v27 = vsub.f32 %v384_v38, %v352_v14  ;;  %v480_v28 = vsub.f32 %v224_v5, %v448_v19  ;;  %vm257_vm2 = vcmp.ge.f32.partialorder %v225_v7, 16.0  ;;  %vm321_vm3 = vcmp.lt.f32.partialorder %v225_v7, 0.0 }
  0x4f   :  { %v1051_v31 = vpop.eup %1050  ;;  %v757_v35 = vmul.f32 %v725_v15, %v585_v11  ;;  %v289_v36 = vsel %vm257_vm2, 1.0, %v1157_v41  ;;  %v353_v22 = vsel %vm321_vm3, 1.0, %v1157_v41  ;;  %v194_v17 = vmul.f32 16.0, %v162_v30 }
  0x50   :  { %v954_v37 = vmin.f32 %v1051_v31, 0.99  ;;  %v544_v42 = vadd.f32 %v512_v49, %v480_v28  ;;  %v622_v43 = vsub.f32 %v416_v27, %v1237_v50  ;;  %v385_v44 = vadd.f32 %v289_v36, %v161_v10 }
  0x51   :  { %v857_v46 = vadd.f32 %v825_v18, %v757_v35  ;;  %v449_v47 = vmul.f32 16.0, %v289_v36  ;;  %v513_v9 = vmul.f32 16.0, %v353_v22  ;;  %v226_v57 = vsub.f32 %v98_v63, %v194_v17 }
  0x52   :  { %986 = vst [vmem:[#allocation5 + $0x20] sm:$0xff] %v954_v37  ;;  %v586_v45 = vsub.f32 %v544_v42, %v1239_v53  ;;  %v694_v48 = vmul.f32 %v1243_v56, %v622_v43  ;;  %v790_v51 = vmul.f32 %v622_v43, %v622_v43  ;;  %v417_v52 = vsub.f32 %v385_v44, %v353_v22 }
  0x53   :  { %v893_v54 = vadd.f32 %v1271_v60, %v857_v46  ;;  %v481_v55 = vsub.f32 %v225_v7, %v449_v47  ;;  %v100_v61 = vcvt.s32.f32 %v1350_v23  ;;  %vm258_vm4 = vcmp.ge.f32.partialorder %v226_v57, 16.0 }
  0x54   :  { %v1053_v8 = vpop.eup %1052  ;;  %v658_v16 = vmul.f32 %v1248_v2, %v586_v45  ;;  %v826_v40 = vmul.f32 %v1250_v3, %v790_v51  ;;  %v623_v59 = vsub.f32 %v417_v52, %v1237_v50  ;;  %v290_v63 = vsel %vm258_vm4, 1.0, %v1157_v41 }
  0x55   :  { %v955_v62 = vmin.f32 %v1053_v8, 0.99  ;;  %1056 = vpow2.f32 %v893_v54  ;;  %v545_v24 = vadd.f32 %v513_v9, %v481_v55  ;;  %vm322_vm5 = vcmp.lt.f32.partialorder %v226_v57, 0.0 }
  0x56   :  { %v726_v26 = vadd.f32 %v694_v48, %v658_v16  ;;  %v695_v34 = vmul.f32 %v1243_v56, %v623_v59  ;;  %v791_v0 = vmul.f32 %v623_v59, %v623_v59  ;;  %v386_v10 = vadd.f32 %v290_v63, %v162_v30 }
  0x57   :  { %v1055_v4 = vpop.eup %1054  ;;  %987 = vst [vmem:[#allocation5 + $0x28] sm:$0xff] %v955_v62  ;;  %v587_v5 = vsub.f32 %v545_v24, %v1239_v53  ;;  %v450_v21 = vmul.f32 16.0, %v290_v63  ;;  %v354_v25 = vsel %vm322_vm5, 1.0, %v1157_v41  ;;  %v195_v19 = vmul.f32 16.0, %v163_v58 }
  0x58   :  { %v956_v11 = vmin.f32 %v1055_v4, 0.99  ;;  %v758_v12 = vmul.f32 %v726_v26, %v586_v45  ;;  %v827_v13 = vmul.f32 %v1250_v3, %v791_v0  ;;  %v418_v18 = vsub.f32 %v386_v10, %v354_v25 }
  0x59   :  { %v659_v33 = vmul.f32 %v1248_v2, %v587_v5  ;;  %v482_v6 = vsub.f32 %v226_v57, %v450_v21  ;;  %v514_v14 = vmul.f32 16.0, %v354_v25  ;;  %v132_v49 = vmul.f32 0.0625, %v100_v61 }
  0x5a   :  { %988 = vst [vmem:[#allocation5 + $0x30] sm:$0xff] %v956_v11  ;;  %v858_v38 = vadd.f32 %v826_v40, %v758_v12  ;;  %v35_v7 = vadd.s32 104, %v1174_v1  ;;  %v624_v20 = vsub.f32 %v418_v18, %v1237_v50  ;;  %v1372_v23 = vadd.s32 112, %v1174_v1 }
  0x5b   :  { %v727_v15 = vadd.f32 %v695_v34, %v659_v33  ;;  %v546_v39 = vadd.f32 %v514_v14, %v482_v6  ;;  %v227_v28 = vsub.f32 %v99_v29, %v195_v19  ;;  %v164_v31 = vfloor.f32 %v132_v49 }
  0x5c   :  { %v894_v27 = vadd.f32 %v1271_v60, %v858_v38  ;;  %v101_v35 = vcvt.s32.f32 %v35_v7  ;;  %v696_v30 = vmul.f32 %v1243_v56, %v624_v20  ;;  %v792_v37 = vmul.f32 %v624_v20, %v624_v20 }
  0x5d   :  { %v759_v36 = vmul.f32 %v727_v15, %v587_v5  ;;  %v588_v22 = vsub.f32 %v546_v39, %v1239_v53  ;;  %vm259_vm6 = vcmp.ge.f32.partialorder %v227_v28, 16.0  ;;  %vm323_vm7 = vcmp.lt.f32.partialorder %v227_v28, 0.0 }
  0x5e   :  { %1058 = vpow2.f32 %v894_v27  ;;  %v196_v42 = vmul.f32 16.0, %v164_v31  ;;  %v828_v46 = vmul.f32 %v1250_v3, %v792_v37  ;;  %v291_v32 = vsel %vm259_vm6, 1.0, %v1157_v41 }
  0x5f   :  { %v859_v43 = vadd.f32 %v827_v13, %v759_v36  ;;  %v660_v44 = vmul.f32 %v1248_v2, %v588_v22  ;;  %v355_v29 = vsel %vm323_vm7, 1.0, %v1157_v41  ;;  %v387_v47 = vadd.f32 %v291_v32, %v163_v58 }
  0x60   :  { %v451_v9 = vmul.f32 16.0, %v291_v32  ;;  %v228_v17 = vsub.f32 %v100_v61, %v196_v42  ;;  %v515_v51 = vmul.f32 16.0, %v355_v29  ;;  %v133_v52 = vmul.f32 0.0625, %v101_v35 }
  0x61   :  { %v895_v45 = vadd.f32 %v1271_v60, %v859_v43  ;;  %v728_v48 = vadd.f32 %v696_v30, %v660_v44  ;;  %v419_v55 = vsub.f32 %v387_v47, %v355_v29  ;;  %v102_v13 = vcvt.s32.f32 %v1372_v23 }
  0x62   :  { %v1057_v54 = vpop.eup %1056  ;;  %v483_v57 = vsub.f32 %v227_v28, %v451_v9  ;;  %vm260_vm8 = vcmp.ge.f32.partialorder %v228_v17, 16.0  ;;  %vm324_vm9 = vcmp.lt.f32.partialorder %v228_v17, 0.0  ;;  %v165_v0 = vfloor.f32 %v133_v52 }
  0x63   :  { %v957_v8 = vmin.f32 %v1057_v54, 0.99  ;;  %1060 = vpow2.f32 %v895_v45  ;;  %v760_v16 = vmul.f32 %v728_v48, %v588_v22  ;;  %v292_v40 = vsel %vm260_vm8, 1.0, %v1157_v41 }
  0x64   :  { %v547_v59 = vadd.f32 %v515_v51, %v483_v57  ;;  %v625_v58 = vsub.f32 %v419_v55, %v1237_v50  ;;  %v356_v61 = vsel %vm324_vm9, 1.0, %v1157_v41  ;;  %v388_v62 = vadd.f32 %v292_v40, %v164_v31 }
  0x65   :  { %989 = vst [vmem:[#allocation5 + $0x38] sm:$0xff] %v957_v8  ;;  %v860_v24 = vadd.f32 %v828_v46, %v760_v16  ;;  %v452_v26 = vmul.f32 16.0, %v292_v40  ;;  %v516_v34 = vmul.f32 16.0, %v356_v61  ;;  %v197_v12 = vmul.f32 16.0, %v165_v0 }
  0x66   :  { %v589_v63 = vsub.f32 %v547_v59, %v1239_v53  ;;  %v697_v4 = vmul.f32 %v1243_v56, %v625_v58  ;;  %v793_v5 = vmul.f32 %v625_v58, %v625_v58  ;;  %v420_v10 = vsub.f32 %v388_v62, %v356_v61 }
  0x67   :  { %v896_v21 = vadd.f32 %v1271_v60, %v860_v24  ;;  %v484_v11 = vsub.f32 %v228_v17, %v452_v26  ;;  %v37_v6 = vadd.s32 120, %v1174_v1  ;;  %v229_v38 = vsub.f32 %v101_v35, %v197_v12 }
  0x68   :  { %v661_v25 = vmul.f32 %v1248_v2, %v589_v63  ;;  %v829_v33 = vmul.f32 %v1250_v3, %v793_v5  ;;  %v626_v18 = vsub.f32 %v420_v10, %v1237_v50  ;;  %v134_v19 = vmul.f32 0.0625, %v102_v13 }
  0x69   :  { %1062 = vpow2.f32 %v896_v21  ;;  %v548_v14 = vadd.f32 %v516_v34, %v484_v11  ;;  %v103_v39 = vcvt.s32.f32 %v37_v6  ;;  %vm261_vm10 = vcmp.ge.f32.partialorder %v229_v38, 16.0 }
  0x6a   :  { %v729_v49 = vadd.f32 %v697_v4, %v661_v25  ;;  %v698_v7 = vmul.f32 %v1243_v56, %v626_v18  ;;  %v794_v15 = vmul.f32 %v626_v18, %v626_v18  ;;  %vm325_vm11 = vcmp.lt.f32.partialorder %v229_v38, 0.0 }
  0x6b   :  { %v1059_v20 = vpop.eup %1058  ;;  %v590_v23 = vsub.f32 %v548_v14, %v1239_v53  ;;  %v166_v27 = vfloor.f32 %v134_v19  ;;  %v293_v22 = vsel %vm261_vm10, 1.0, %v1157_v41  ;;  %v357_v30 = vsel %vm325_vm11, 1.0, %v1157_v41 }
  0x6c   :  { %v958_v28 = vmin.f32 %v1059_v20, 0.99  ;;  %v761_v31 = vmul.f32 %v729_v49, %v589_v63  ;;  %v830_v36 = vmul.f32 %v1250_v3, %v794_v15  ;;  %v389_v37 = vadd.f32 %v293_v22, %v165_v0 }
  0x6d   :  { %v662_v35 = vmul.f32 %v1248_v2, %v590_v23  ;;  %v453_v42 = vmul.f32 16.0, %v293_v22  ;;  %v517_v44 = vmul.f32 16.0, %v357_v30  ;;  %v198_v46 = vmul.f32 16.0, %v166_v27 }
  0x6e   :  { %990 = vst [vmem:[#allocation5 + $0x40] sm:$0xff] %v958_v28  ;;  %v861_v43 = vadd.f32 %v829_v33, %v761_v31  ;;  %v135_v32 = vmul.f32 0.0625, %v103_v39  ;;  %v421_v47 = vsub.f32 %v389_v37, %v357_v30  ;;  %v1402_v17 = vadd.s32 128, %v1174_v1 }
  0x6f   :  { %v730_v29 = vadd.f32 %v698_v7, %v662_v35  ;;  %v485_v9 = vsub.f32 %v229_v38, %v453_v42  ;;  %v230_v51 = vsub.f32 %v102_v13, %v198_v46  ;;  %v1406_v54 = vadd.s32 136, %v1174_v1 }
  0x70   :  { %v1061_v45 = vpop.eup %1060  ;;  %v897_v48 = vadd.f32 %v1271_v60, %v861_v43  ;;  %v167_v52 = vfloor.f32 %v135_v32  ;;  %v627_v16 = vsub.f32 %v421_v47, %v1237_v50  ;;  %v104_v0 = vcvt.s32.f32 %v1402_v17 }
  0x71   :  { %v959_v55 = vmin.f32 %v1061_v45, 0.99  ;;  %v762_v57 = vmul.f32 %v730_v29, %v590_v23  ;;  %v549_v8 = vadd.f32 %v517_v44, %v485_v9  ;;  %vm262_vm12 = vcmp.ge.f32.partialorder %v230_v51, 16.0 }
  0x72   :  { %1064 = vpow2.f32 %v897_v48  ;;  %vm326_vm13 = vcmp.lt.f32.partialorder %v230_v51, 0.0  ;;  %v199_v40 = vmul.f32 16.0, %v167_v52  ;;  %v699_v61 = vmul.f32 %v1243_v56, %v627_v16 }
  0x73   :  { %991 = vst [vmem:[#allocation5 + $0x48] sm:$0xff] %v959_v55  ;;  %v862_v59 = vadd.f32 %v830_v36, %v762_v57  ;;  %v591_v58 = vsub.f32 %v549_v8, %v1239_v53  ;;  %v795_v62 = vmul.f32 %v627_v16, %v627_v16  ;;  %v294_v24 = vsel %vm262_vm12, 1.0, %v1157_v41 }
  0x74   :  { %v358_v26 = vsel %vm326_vm13, 1.0, %v1157_v41  ;;  %v231_v34 = vsub.f32 %v103_v39, %v199_v40  ;;  %v390_v10 = vadd.f32 %v294_v24, %v166_v27  ;;  %v454_v11 = vmul.f32 16.0, %v294_v24 }
  0x75   :  { %v898_v63 = vadd.f32 %v1271_v60, %v862_v59  ;;  %v663_v4 = vmul.f32 %v1248_v2, %v591_v58  ;;  %v831_v5 = vmul.f32 %v1250_v3, %v795_v62  ;;  %v518_v12 = vmul.f32 16.0, %v358_v26 }
  0x76   :  { %v1063_v21 = vpop.eup %1062  ;;  %vm263_vm14 = vcmp.ge.f32.partialorder %v231_v34, 16.0  ;;  %vm327_vm15 = vcmp.lt.f32.partialorder %v231_v34, 0.0  ;;  %v422_v33 = vsub.f32 %v390_v10, %v358_v26  ;;  %v486_v18 = vsub.f32 %v230_v51, %v454_v11 }
  0x77   :  { %v960_v13 = vmin.f32 %v1063_v21, 0.99  ;;  %1066 = vpow2.f32 %v898_v63  ;;  %v731_v25 = vadd.f32 %v699_v61, %v663_v4  ;;  %v295_v6 = vsel %vm263_vm14, 1.0, %v1157_v41 }
  0x78   :  { %v359_v14 = vsel %vm327_vm15, 1.0, %v1157_v41  ;;  %v136_v38 = vmul.f32 0.0625, %v104_v0  ;;  %v628_v49 = vsub.f32 %v422_v33, %v1237_v50  ;;  %v391_v7 = vadd.f32 %v295_v6, %v167_v52 }
  0x79   :  { %992 = vst [vmem:[#allocation5 + $0x50] sm:$0xff] %v960_v13  ;;  %v763_v19 = vmul.f32 %v731_v25, %v591_v58  ;;  %v455_v15 = vmul.f32 16.0, %v295_v6  ;;  %v550_v39 = vadd.f32 %v518_v12, %v486_v18  ;;  %v519_v20 = vmul.f32 16.0, %v359_v14 }
  0x7a   :  { %v168_v23 = vfloor.f32 %v136_v38  ;;  %v105_v27 = vcvt.s32.f32 %v1406_v54  ;;  %v700_v31 = vmul.f32 %v1243_v56, %v628_v49  ;;  %v796_v36 = vmul.f32 %v628_v49, %v628_v49 }
  0x7b   :  { %v863_v28 = vadd.f32 %v831_v5, %v763_v19  ;;  %v423_v22 = vsub.f32 %v391_v7, %v359_v14  ;;  %v592_v35 = vsub.f32 %v550_v39, %v1239_v53  ;;  %v487_v30 = vsub.f32 %v231_v34, %v455_v15 }
  0x7c   :  { %v200_v37 = vmul.f32 16.0, %v168_v23  ;;  %v137_v42 = vmul.f32 0.0625, %v105_v27  ;;  %v832_v44 = vmul.f32 %v1250_v3, %v796_v36  ;;  %v1427_v32 = vadd.s32 144, %v1174_v1 }
  0x7d   :  { %v899_v43 = vadd.f32 %v1271_v60, %v863_v28  ;;  %v629_v46 = vsub.f32 %v423_v22, %v1237_v50  ;;  %v664_v29 = vmul.f32 %v1248_v2, %v592_v35  ;;  %v551_v47 = vadd.f32 %v519_v20, %v487_v30 }
  0x7e   :  { %v232_v9 = vsub.f32 %v104_v0, %v200_v37  ;;  %v169_v17 = vfloor.f32 %v137_v42  ;;  %v106_v52 = vcvt.s32.f32 %v1427_v32  ;;  %v41_v21 = vadd.s32 152, %v1174_v1 }
  0x7f   :  { %v1065_v45 = vpop.eup %1064  ;;  %1068 = vpow2.f32 %v899_v43  ;;  %v701_v48 = vmul.f32 %v1243_v56, %v629_v46  ;;  %v797_v51 = vmul.f32 %v629_v46, %v629_v46  ;;  %v732_v55 = vadd.f32 %v700_v31, %v664_v29 }
  0x80   :  { %v961_v54 = vmin.f32 %v1065_v45, 0.99  ;;  %v593_v57 = vsub.f32 %v551_v47, %v1239_v53  ;;  %vm264_vm0 = vcmp.ge.f32.partialorder %v232_v9, 16.0  ;;  %vm328_vm1 = vcmp.lt.f32.partialorder %v232_v9, 0.0 }
  0x81   :  { %v833_v8 = vmul.f32 %v1250_v3, %v797_v51  ;;  %v296_v16 = vsel %vm264_vm0, 1.0, %v1157_v41  ;;  %v201_v40 = vmul.f32 16.0, %v169_v17  ;;  %v764_v59 = vmul.f32 %v732_v55, %v592_v35 }
  0x82   :  { %993 = vst [vmem:[#allocation5 + $0x58] sm:$0xff] %v961_v54  ;;  %v665_v58 = vmul.f32 %v1248_v2, %v593_v57  ;;  %v360_v61 = vsel %vm328_vm1, 1.0, %v1157_v41  ;;  %v392_v62 = vadd.f32 %v296_v16, %v168_v23  ;;  %v456_v24 = vmul.f32 16.0, %v296_v16 }
  0x83   :  { %v520_v26 = vmul.f32 16.0, %v360_v61  ;;  %v233_v34 = vsub.f32 %v105_v27, %v201_v40  ;;  %v138_v0 = vmul.f32 0.0625, %v106_v52  ;;  %v864_v4 = vadd.f32 %v832_v44, %v764_v59 }
  0x84   :  { %v1067_v63 = vpop.eup %1066  ;;  %v733_v5 = vadd.f32 %v701_v48, %v665_v58  ;;  %v424_v10 = vsub.f32 %v392_v62, %v360_v61  ;;  %v488_v12 = vsub.f32 %v232_v9, %v456_v24  ;;  %v107_v22 = vcvt.s32.f32 %v41_v21 }
  0x85   :  { %v962_v11 = vmin.f32 %v1067_v63, 0.99  ;;  %vm265_vm2 = vcmp.ge.f32.partialorder %v233_v34, 16.0  ;;  %vm329_vm3 = vcmp.lt.f32.partialorder %v233_v34, 0.0  ;;  %v900_v13 = vadd.f32 %v1271_v60, %v864_v4 }
  0x86   :  { %v765_v25 = vmul.f32 %v733_v5, %v593_v57  ;;  %v630_v33 = vsub.f32 %v424_v10, %v1237_v50  ;;  %v297_v18 = vsel %vm265_vm2, 1.0, %v1157_v41  ;;  %v552_v6 = vadd.f32 %v520_v26, %v488_v12 }
  0x87   :  { %994 = vst [vmem:[#allocation5 + $0x60] sm:$0xff] %v962_v11  ;;  %v361_v14 = vsel %vm329_vm3, 1.0, %v1157_v41  ;;  %v393_v38 = vadd.f32 %v297_v18, %v169_v17  ;;  %v457_v19 = vmul.f32 16.0, %v297_v18  ;;  %1070 = vpow2.f32 %v900_v13  ;;  %v1472_v13 = vld [vmem:[#allocation2 + $0x1] ss:$0 sm:$0xff] }
  0x88   :  { %v865_v49 = vadd.f32 %v833_v8, %v765_v25  ;;  %v702_v7 = vmul.f32 %v1243_v56, %v630_v33  ;;  %v798_v15 = vmul.f32 %v630_v33, %v630_v33  ;;  %v594_v39 = vsub.f32 %v552_v6, %v1239_v53 }
  0x89   :  { %v425_v20 = vsub.f32 %v393_v38, %v361_v14  ;;  %v489_v23 = vsub.f32 %v233_v34, %v457_v19  ;;  %v521_v27 = vmul.f32 16.0, %v361_v14  ;;  %v170_v36 = vfloor.f32 %v138_v0  ;;  %v1476_v19 = vld [vmem:[#allocation2] ss:$0 sm:$0xff] }
  0x8a   :  { %v901_v28 = vadd.f32 %v1271_v60, %v865_v49  ;;  %v834_v31 = vmul.f32 %v1250_v3, %v798_v15  ;;  %v666_v35 = vmul.f32 %v1248_v2, %v594_v39  ;;  %v1449_v42 = vadd.s32 160, %v1174_v1 }
  0x8b   :  { %v553_v30 = vadd.f32 %v521_v27, %v489_v23  ;;  %v631_v37 = vsub.f32 %v425_v20, %v1237_v50  ;;  %v202_v44 = vmul.f32 16.0, %v170_v36  ;;  %v139_v46 = vmul.f32 0.0625, %v107_v22 }
  0x8c   :  { %v1069_v43 = vpop.eup %1068  ;;  %1072 = vpow2.f32 %v901_v28  ;;  %v1452_v32 = vadd.s32 168, %v1174_v1  ;;  %v734_v47 = vadd.f32 %v702_v7, %v666_v35  ;;  %v108_v50 = vcvt.s32.f32 %v1449_v42  ;;  %v1479_v7 = vld [vmem:[#allocation2 + $0x4] ss:$0 sm:$0xff]  ;;  %v1486_v35 = vld [vmem:[#allocation2 + $0x3] ss:$0 sm:$0xff] }
  0x8d   :  { %v963_v29 = vmin.f32 %v1069_v43, 0.99  ;;  %v595_v9 = vsub.f32 %v553_v30, %v1239_v53  ;;  %v703_v17 = vmul.f32 %v1243_v56, %v631_v37  ;;  %v799_v45 = vmul.f32 %v631_v37, %v631_v37 }
  0x8e   :  { %v234_v48 = vsub.f32 %v106_v52, %v202_v44  ;;  %v171_v51 = vfloor.f32 %v139_v46  ;;  %v766_v54 = vmul.f32 %v734_v47, %v594_v39  ;;  %v109_v57 = vcvt.s32.f32 %v1452_v32 }
  0x8f   :  { %995 = vst [vmem:[#allocation5 + $0x68] sm:$0xff] %v963_v29  ;;  %v667_v55 = vmul.f32 %v1248_v2, %v595_v9  ;;  %v1460_v8 = vadd.s32 176, %v1174_v1  ;;  %v835_v16 = vmul.f32 %v1250_v3, %v799_v45  ;;  %v140_v34 = vmul.f32 0.0625, %v108_v50 }
  0x90   :  { %vm266_vm4 = vcmp.ge.f32.partialorder %v234_v48, 16.0  ;;  %vm330_vm5 = vcmp.lt.f32.partialorder %v234_v48, 0.0  ;;  %v203_v53 = vmul.f32 16.0, %v171_v51  ;;  %v866_v56 = vadd.f32 %v834_v31, %v766_v54 }
  0x91   :  { %v735_v40 = vadd.f32 %v703_v17, %v667_v55  ;;  %v298_v52 = vsel %vm266_vm4, 1.0, %v1157_v41  ;;  %v362_v59 = vsel %vm330_vm5, 1.0, %v1157_v41  ;;  %v1468_v3 = vmul.f32 0.0625, %v109_v57 }
  0x92   :  { %v394_v58 = vadd.f32 %v298_v52, %v170_v36  ;;  %v458_v61 = vmul.f32 16.0, %v298_v52  ;;  %v522_v62 = vmul.f32 16.0, %v362_v59  ;;  %v235_v2 = vsub.f32 %v107_v22, %v203_v53  ;;  %v1483_v36 = vld [vmem:[#allocation2 + $0x2] ss:$0 sm:$0xff] }
  0x93   :  { %v902_v24 = vadd.f32 %v1271_v60, %v866_v56  ;;  %v767_v26 = vmul.f32 %v735_v40, %v595_v9  ;;  %v172_v38 = vfloor.f32 %v140_v34  ;;  %v110_v46 = vcvt.s32.f32 %v1460_v8 }
  0x94   :  { %v426_v0 = vsub.f32 %v394_v58, %v362_v59  ;;  %v490_v63 = vsub.f32 %v234_v48, %v458_v61  ;;  %vm267_vm6 = vcmp.ge.f32.partialorder %v235_v2, 16.0  ;;  %vm331_vm7 = vcmp.lt.f32.partialorder %v235_v2, 0.0  ;;  %v1071_v4 = vpop.eup %1070 }
  0x95   :  { %1074 = vpow2.f32 %v902_v24  ;;  %v867_v5 = vadd.f32 %v835_v16, %v767_v26  ;;  %v299_v10 = vsel %vm267_vm6, 1.0, %v1157_v41  ;;  %v363_v21 = vsel %vm331_vm7, 1.0, %v1157_v41 }
  0x96   :  { %v964_v11 = vmin.f32 %v1071_v4, 0.99  ;;  %v554_v12 = vadd.f32 %v522_v62, %v490_v63  ;;  %v632_v25 = vsub.f32 %v426_v0, %v1472_v13  ;;  %v395_v33 = vadd.f32 %v299_v10, %v171_v51 }
  0x97   :  { %v903_v18 = vadd.f32 %v1271_v60, %v867_v5  ;;  %v459_v6 = vmul.f32 16.0, %v299_v10  ;;  %v523_v14 = vmul.f32 16.0, %v363_v21  ;;  %v204_v28 = vmul.f32 16.0, %v172_v38 }
  0x98   :  { %996 = vst [vmem:[#allocation5 + $0x70] sm:$0xff] %v964_v11  ;;  %v596_v49 = vsub.f32 %v554_v12, %v1476_v19  ;;  %v704_v15 = vmul.f32 %v1479_v7, %v632_v25  ;;  %v800_v39 = vmul.f32 %v632_v25, %v632_v25  ;;  %v427_v20 = vsub.f32 %v395_v33, %v363_v21 }
  0x99   :  { %v1073_v23 = vpop.eup %1072  ;;  %1076 = vpow2.f32 %v903_v18  ;;  %v491_v27 = vsub.f32 %v235_v2, %v459_v6  ;;  %v173_v60 = vfloor.f32 %v1468_v3  ;;  %v236_v43 = vsub.f32 %v108_v50, %v204_v28  ;;  %v1505_v2 = vld [vmem:[#allocation2 + $0x5] ss:$0 sm:$0xff] }
  0x9a   :  { %v965_v31 = vmin.f32 %v1073_v23, 0.99  ;;  %v668_v22 = vmul.f32 %v1483_v36, %v596_v49  ;;  %v836_v30 = vmul.f32 %v1486_v35, %v800_v39  ;;  %v633_v37 = vsub.f32 %v427_v20, %v1472_v13 }
  0x9b   :  { %v555_v42 = vadd.f32 %v523_v14, %v491_v27  ;;  %v205_v44 = vmul.f32 16.0, %v173_v60  ;;  %v1493_v17 = vadd.s32 184, %v1174_v1  ;;  %vm268_vm8 = vcmp.ge.f32.partialorder %v236_v43, 16.0 }
  0x9c   :  { %997 = vst [vmem:[#allocation5 + $0x78] sm:$0xff] %v965_v31  ;;  %v736_v29 = vadd.f32 %v704_v15, %v668_v22  ;;  %v705_v47 = vmul.f32 %v1479_v7, %v633_v37  ;;  %v801_v9 = vmul.f32 %v633_v37, %v633_v37  ;;  %vm332_vm9 = vcmp.lt.f32.partialorder %v236_v43, 0.0 }
  0x9d   :  { %v597_v45 = vsub.f32 %v555_v42, %v1476_v19  ;;  %v237_v48 = vsub.f32 %v109_v57, %v205_v44  ;;  %v300_v54 = vsel %vm268_vm8, 1.0, %v1157_v41  ;;  %v364_v55 = vsel %vm332_vm9, 1.0, %v1157_v41 }
  0x9e   :  { %v768_v51 = vmul.f32 %v736_v29, %v596_v49  ;;  %v837_v50 = vmul.f32 %v1486_v35, %v801_v9  ;;  %v396_v53 = vadd.f32 %v300_v54, %v172_v38  ;;  %v460_v56 = vmul.f32 16.0, %v300_v54 }
  0x9f   :  { %v669_v16 = vmul.f32 %v1483_v36, %v597_v45  ;;  %v524_v40 = vmul.f32 16.0, %v364_v55  ;;  %vm269_vm10 = vcmp.ge.f32.partialorder %v237_v48, 16.0  ;;  %vm333_vm11 = vcmp.lt.f32.partialorder %v237_v48, 0.0 }
  0xa0   :  { %v868_v52 = vadd.f32 %v836_v30, %v768_v51  ;;  %v142_v59 = vmul.f32 0.0625, %v110_v46  ;;  %v428_v57 = vsub.f32 %v396_v53, %v364_v55  ;;  %v492_v58 = vsub.f32 %v236_v43, %v460_v56 }
  0xa1   :  { %v737_v32 = vadd.f32 %v705_v47, %v669_v16  ;;  %v301_v61 = vsel %vm269_vm10, 1.0, %v1157_v41  ;;  %v365_v26 = vsel %vm333_vm11, 1.0, %v1157_v41  ;;  %v111_v15 = vcvt.s32.f32 %v1493_v17 }
  0xa2   :  { %v1075_v62 = vpop.eup %1074  ;;  %v904_v24 = vadd.f32 %v1505_v2, %v868_v52  ;;  %v397_v34 = vadd.f32 %v301_v61, %v173_v60  ;;  %v461_v3 = vmul.f32 16.0, %v301_v61  ;;  %v556_v4 = vadd.f32 %v524_v40, %v492_v58 }
  0xa3   :  { %v966_v0 = vmin.f32 %v1075_v62, 0.99  ;;  %v769_v63 = vmul.f32 %v737_v32, %v597_v45  ;;  %v634_v5 = vsub.f32 %v428_v57, %v1472_v13  ;;  %v525_v11 = vmul.f32 16.0, %v365_v26 }
  0xa4   :  { %1078 = vpow2.f32 %v904_v24  ;;  %v429_v10 = vsub.f32 %v397_v34, %v365_v26  ;;  %v493_v21 = vsub.f32 %v237_v48, %v461_v3  ;;  %v598_v25 = vsub.f32 %v556_v4, %v1476_v19 }
  0xa5   :  { %998 = vst [vmem:[#allocation5 + $0x80] sm:$0xff] %v966_v0  ;;  %v869_v12 = vadd.f32 %v837_v50, %v769_v63  ;;  %v706_v33 = vmul.f32 %v1479_v7, %v634_v5  ;;  %v802_v18 = vmul.f32 %v634_v5, %v634_v5  ;;  %v174_v49 = vfloor.f32 %v142_v59 }
  0xa6   :  { %v1077_v6 = vpop.eup %1076  ;;  %v557_v14 = vadd.f32 %v525_v11, %v493_v21  ;;  %v635_v38 = vsub.f32 %v429_v10, %v1472_v13  ;;  %v670_v23 = vmul.f32 %v1483_v36, %v598_v25  ;;  %v143_v37 = vmul.f32 0.0625, %v111_v15 }
  0xa7   :  { %v967_v39 = vmin.f32 %v1077_v6, 0.99  ;;  %v905_v20 = vadd.f32 %v1505_v2, %v869_v12  ;;  %v838_v27 = vmul.f32 %v1486_v35, %v802_v18  ;;  %v206_v22 = vmul.f32 16.0, %v174_v49 }
  0xa8   :  { %v599_v28 = vsub.f32 %v557_v14, %v1476_v19  ;;  %v707_v60 = vmul.f32 %v1479_v7, %v635_v38  ;;  %v803_v31 = vmul.f32 %v635_v38, %v635_v38  ;;  %v738_v30 = vadd.f32 %v706_v33, %v670_v23 }
  0xa9   :  { %999 = vst [vmem:[#allocation5 + $0x88] sm:$0xff] %v967_v39  ;;  %1080 = vpow2.f32 %v905_v20  ;;  %v46_v42 = vadd.s32 192, %v1174_v1  ;;  %v238_v29 = vsub.f32 %v110_v46, %v206_v22  ;;  %v47_v47 = vadd.s32 200, %v1174_v1 }
  0xaa   :  { %v671_v43 = vmul.f32 %v1483_v36, %v599_v28  ;;  %v839_v44 = vmul.f32 %v1486_v35, %v803_v31  ;;  %v770_v9 = vmul.f32 %v738_v30, %v598_v25  ;;  %v175_v17 = vfloor.f32 %v143_v37 }
  0xab   :  { %v112_v45 = vcvt.s32.f32 %v46_v42  ;;  %v1526_v48 = vadd.s32 208, %v1174_v1  ;;  %vm270_vm12 = vcmp.ge.f32.partialorder %v238_v29, 16.0  ;;  %vm334_vm13 = vcmp.lt.f32.partialorder %v238_v29, 0.0 }
  0xac   :  { %v739_v51 = vadd.f32 %v707_v60, %v671_v43  ;;  %v113_v50 = vcvt.s32.f32 %v47_v47  ;;  %v870_v54 = vadd.f32 %v838_v27, %v770_v9  ;;  %v302_v55 = vsel %vm270_vm12, 1.0, %v1157_v41 }
  0xad   :  { %v366_v16 = vsel %vm334_vm13, 1.0, %v1157_v41  ;;  %v207_v53 = vmul.f32 16.0, %v175_v17  ;;  %v398_v46 = vadd.f32 %v302_v55, %v174_v49  ;;  %v462_v56 = vmul.f32 16.0, %v302_v55 }
  0xae   :  { %v771_v8 = vmul.f32 %v739_v51, %v599_v28  ;;  %v526_v40 = vmul.f32 16.0, %v366_v16  ;;  %v906_v52 = vadd.f32 %v1505_v2, %v870_v54  ;;  %v144_v32 = vmul.f32 0.0625, %v112_v45 }
  0xaf   :  { %v239_v59 = vsub.f32 %v111_v15, %v207_v53  ;;  %v1531_v57 = vmul.f32 0.0625, %v113_v50  ;;  %v430_v61 = vsub.f32 %v398_v46, %v366_v16  ;;  %v494_v62 = vsub.f32 %v238_v29, %v462_v56 }
  0xb0   :  { %v871_v58 = vadd.f32 %v839_v44, %v771_v8  ;;  %v114_v24 = vcvt.s32.f32 %v1526_v48  ;;  %1082 = vpow2.f32 %v906_v52  ;;  %v176_v34 = vfloor.f32 %v144_v32 }
  0xb1   :  { %v1079_v26 = vpop.eup %1078  ;;  %vm271_vm14 = vcmp.ge.f32.partialorder %v239_v59, 16.0  ;;  %vm335_vm15 = vcmp.lt.f32.partialorder %v239_v59, 0.0  ;;  %v558_v63 = vadd.f32 %v526_v40, %v494_v62  ;;  %v636_v4 = vsub.f32 %v430_v61, %v1472_v13 }
  0xb2   :  { %v968_v3 = vmin.f32 %v1079_v26, 0.99  ;;  %v907_v0 = vadd.f32 %v1505_v2, %v871_v58  ;;  %v303_v5 = vsel %vm271_vm14, 1.0, %v1157_v41  ;;  %v367_v10 = vsel %vm335_vm15, 1.0, %v1157_v41 }
  0xb3   :  { %v208_v21 = vmul.f32 16.0, %v176_v34  ;;  %v177_v11 = vfloor.f32 %v1531_v57  ;;  %v600_v12 = vsub.f32 %v558_v63, %v1476_v19  ;;  %v708_v25 = vmul.f32 %v1479_v7, %v636_v4 }
  0xb4   :  { %1000 = vst [vmem:[#allocation5 + $0x90] sm:$0xff] %v968_v3  ;;  %1084 = vpow2.f32 %v907_v0  ;;  %v804_v33 = vmul.f32 %v636_v4, %v636_v4  ;;  %v399_v18 = vadd.f32 %v303_v5, %v175_v17  ;;  %v463_v6 = vmul.f32 16.0, %v303_v5 }
  0xb5   :  { %v527_v14 = vmul.f32 16.0, %v367_v10  ;;  %v240_v38 = vsub.f32 %v112_v45, %v208_v21  ;;  %v672_v15 = vmul.f32 %v1483_v36, %v600_v12  ;;  %v209_v20 = vmul.f32 16.0, %v177_v11 }
  0xb6   :  { %v1081_v49 = vpop.eup %1080  ;;  %v840_v39 = vmul.f32 %v1486_v35, %v804_v33  ;;  %v1545_v23 = vmul.f32 0.0625, %v114_v24  ;;  %v431_v28 = vsub.f32 %v399_v18, %v367_v10  ;;  %v495_v60 = vsub.f32 %v239_v59, %v463_v6 }
  0xb7   :  { %v969_v27 = vmin.f32 %v1081_v49, 0.99  ;;  %vm272_vm0 = vcmp.ge.f32.partialorder %v240_v38, 16.0  ;;  %v740_v31 = vadd.f32 %v708_v25, %v672_v15  ;;  %vm336_vm1 = vcmp.lt.f32.partialorder %v240_v38, 0.0 }
  0xb8   :  { %v304_v22 = vsel %vm272_vm0, 1.0, %v1157_v41  ;;  %v241_v30 = vsub.f32 %v113_v50, %v209_v20  ;;  %v559_v37 = vadd.f32 %v527_v14, %v495_v60  ;;  %v637_v42 = vsub.f32 %v431_v28, %v1472_v13 }
  0xb9   :  { %1001 = vst [vmem:[#allocation5 + $0x98] sm:$0xff] %v969_v27  ;;  %v368_v43 = vsel %vm336_vm1, 1.0, %v1157_v41  ;;  %v400_v44 = vadd.f32 %v304_v22, %v176_v34  ;;  %v772_v29 = vmul.f32 %v740_v31, %v600_v12  ;;  %v464_v47 = vmul.f32 16.0, %v304_v22 }
  0xba   :  { %v528_v9 = vmul.f32 16.0, %v368_v43  ;;  %vm273_vm2 = vcmp.ge.f32.partialorder %v241_v30, 16.0  ;;  %v601_v17 = vsub.f32 %v559_v37, %v1476_v19  ;;  %v709_v45 = vmul.f32 %v1479_v7, %v637_v42 }
  0xbb   :  { %v805_v51 = vmul.f32 %v637_v42, %v637_v42  ;;  %v432_v54 = vsub.f32 %v400_v44, %v368_v43  ;;  %v872_v55 = vadd.f32 %v840_v39, %v772_v29  ;;  %v496_v16 = vsub.f32 %v240_v38, %v464_v47 }
  0xbc   :  { %v305_v50 = vsel %vm273_vm2, 1.0, %v1157_v41  ;;  %vm337_vm3 = vcmp.lt.f32.partialorder %v241_v30, 0.0  ;;  %v673_v53 = vmul.f32 %v1483_v36, %v601_v17  ;;  %v178_v21 = vfloor.f32 %v1545_v23 }
  0xbd   :  { %v841_v8 = vmul.f32 %v1486_v35, %v805_v51  ;;  %v638_v46 = vsub.f32 %v432_v54, %v1472_v13  ;;  %v369_v56 = vsel %vm337_vm3, 1.0, %v1157_v41  ;;  %v1083_v40 = vpop.eup %1082  ;;  %v908_v52 = vadd.f32 %v1505_v2, %v872_v55 }
  0xbe   :  { %v560_v59 = vadd.f32 %v528_v9, %v496_v16  ;;  %v401_v32 = vadd.f32 %v305_v50, %v177_v11  ;;  %v465_v57 = vmul.f32 16.0, %v305_v50  ;;  %v970_v58 = vmin.f32 %v1083_v40, 0.99 }
  0xbf   :  { %v741_v61 = vadd.f32 %v709_v45, %v673_v53  ;;  %v710_v62 = vmul.f32 %v1479_v7, %v638_v46  ;;  %v806_v26 = vmul.f32 %v638_v46, %v638_v46  ;;  %1086 = vpow2.f32 %v908_v52 }
  0xc0   :  { %v602_v34 = vsub.f32 %v560_v59, %v1476_v19  ;;  %v433_v3 = vsub.f32 %v401_v32, %v369_v56  ;;  %v497_v0 = vsub.f32 %v241_v30, %v465_v57  ;;  %1002 = vst [vmem:[#allocation5 + $0xa0] sm:$0xff] %v970_v58  ;;  %v529_v10 = vmul.f32 16.0, %v369_v56 }
  0xc1   :  { %v1085_v63 = vpop.eup %1084  ;;  %v773_v4 = vmul.f32 %v741_v61, %v601_v17  ;;  %v842_v5 = vmul.f32 %v1486_v35, %v806_v26  ;;  %v49_v33 = vadd.s32 216, %v1174_v1  ;;  %v210_v14 = vmul.f32 16.0, %v178_v21 }
  0xc2   :  { %v971_v11 = vmin.f32 %v1085_v63, 0.99  ;;  %v674_v12 = vmul.f32 %v1483_v36, %v602_v34  ;;  %v639_v25 = vsub.f32 %v433_v3, %v1472_v13  ;;  %v561_v6 = vadd.f32 %v529_v10, %v497_v0 }
  0xc3   :  { %v873_v18 = vadd.f32 %v841_v8, %v773_v4  ;;  %v50_v38 = vadd.s32 224, %v1174_v1  ;;  %v115_v20 = vcvt.s32.f32 %v49_v33  ;;  %v242_v28 = vsub.f32 %v114_v24, %v210_v14 }
  0xc4   :  { %1003 = vst [vmem:[#allocation5 + $0xa8] sm:$0xff] %v971_v11  ;;  %v742_v49 = vadd.f32 %v710_v62, %v674_v12  ;;  %v711_v15 = vmul.f32 %v1479_v7, %v639_v25  ;;  %v807_v39 = vmul.f32 %v639_v25, %v639_v25  ;;  %v603_v27 = vsub.f32 %v561_v6, %v1476_v19 }
  0xc5   :  { %v909_v23 = vadd.f32 %v1505_v2, %v873_v18  ;;  %v116_v60 = vcvt.s32.f32 %v50_v38  ;;  %v147_v30 = vmul.f32 0.0625, %v115_v20  ;;  %v1573_v37 = vadd.s32 232, %v1174_v1 }
  0xc6   :  { %v774_v31 = vmul.f32 %v742_v49, %v602_v34  ;;  %v843_v22 = vmul.f32 %v1486_v35, %v807_v39  ;;  %v675_v42 = vmul.f32 %v1483_v36, %v603_v27  ;;  %vm274_vm4 = vcmp.ge.f32.partialorder %v242_v28, 16.0 }
  0xc7   :  { %1088 = vpow2.f32 %v909_v23  ;;  %vm338_vm5 = vcmp.lt.f32.partialorder %v242_v28, 0.0  ;;  %v306_v44 = vsel %vm274_vm4, 1.0, %v1157_v41  ;;  %v179_v48 = vfloor.f32 %v147_v30 }
  0xc8   :  { %v874_v43 = vadd.f32 %v842_v5, %v774_v31  ;;  %v370_v29 = vsel %vm338_vm5, 1.0, %v1157_v41  ;;  %v743_v24 = vadd.f32 %v711_v15, %v675_v42  ;;  %v402_v47 = vadd.f32 %v306_v44, %v178_v21 }
  0xc9   :  { %v466_v9 = vmul.f32 16.0, %v306_v44  ;;  %v530_v17 = vmul.f32 16.0, %v370_v29  ;;  %v211_v51 = vmul.f32 16.0, %v179_v48  ;;  %v148_v54 = vmul.f32 0.0625, %v116_v60 }
  0xca   :  { %v910_v45 = vadd.f32 %v1505_v2, %v874_v43  ;;  %v117_v55 = vcvt.s32.f32 %v1573_v37  ;;  %v775_v16 = vmul.f32 %v743_v24, %v603_v27  ;;  %v434_v50 = vsub.f32 %v402_v47, %v370_v29 }
  0xcb   :  { %v498_v53 = vsub.f32 %v242_v28, %v466_v9  ;;  %v1581_v8 = vadd.s32 240, %v1174_v1  ;;  %v243_v46 = vsub.f32 %v115_v20, %v211_v51  ;;  %v180_v56 = vfloor.f32 %v148_v54 }
  0xcc   :  { %1090 = vpow2.f32 %v910_v45  ;;  %v1583_v40 = vmul.f32 0.0625, %v117_v55  ;;  %v1087_v52 = vpop.eup %1086  ;;  %v875_v59 = vadd.f32 %v843_v22, %v775_v16  ;;  %v640_v57 = vsub.f32 %v434_v50, %v1472_v13 }
  0xcd   :  { %v562_v32 = vadd.f32 %v530_v17, %v498_v53  ;;  %v118_v58 = vcvt.s32.f32 %v1581_v8  ;;  %v972_v61 = vmin.f32 %v1087_v52, 0.99  ;;  %vm275_vm6 = vcmp.ge.f32.partialorder %v243_v46, 16.0 }
  0xce   :  { %vm339_vm7 = vcmp.lt.f32.partialorder %v243_v46, 0.0  ;;  %v212_v62 = vmul.f32 16.0, %v180_v56  ;;  %v911_v26 = vadd.f32 %v1505_v2, %v875_v59  ;;  %v712_v3 = vmul.f32 %v1479_v7, %v640_v57 }
  0xcf   :  { %v604_v34 = vsub.f32 %v562_v32, %v1476_v19  ;;  %v808_v0 = vmul.f32 %v640_v57, %v640_v57  ;;  %1004 = vst [vmem:[#allocation5 + $0xb0] sm:$0xff] %v972_v61  ;;  %v307_v63 = vsel %vm275_vm6, 1.0, %v1157_v41  ;;  %v371_v4 = vsel %vm339_vm7, 1.0, %v1157_v41 }
  0xd0   :  { %v244_v5 = vsub.f32 %v116_v60, %v212_v62  ;;  %v181_v10 = vfloor.f32 %v1583_v40  ;;  %1092 = vpow2.f32 %v911_v26  ;;  %v403_v12 = vadd.f32 %v307_v63, %v179_v48 }
  0xd1   :  { %v676_v21 = vmul.f32 %v1483_v36, %v604_v34  ;;  %v844_v11 = vmul.f32 %v1486_v35, %v808_v0  ;;  %v467_v25 = vmul.f32 16.0, %v307_v63  ;;  %v531_v33 = vmul.f32 16.0, %v371_v4 }
  0xd2   :  { %vm276_vm8 = vcmp.ge.f32.partialorder %v244_v5, 16.0  ;;  %vm340_vm9 = vcmp.lt.f32.partialorder %v244_v5, 0.0  ;;  %v435_v6 = vsub.f32 %v403_v12, %v371_v4  ;;  %v213_v31 = vmul.f32 16.0, %v181_v10 }
  0xd3   :  { %v744_v18 = vadd.f32 %v712_v3, %v676_v21  ;;  %v308_v14 = vsel %vm276_vm8, 1.0, %v1157_v41  ;;  %v372_v38 = vsel %vm340_vm9, 1.0, %v1157_v41  ;;  %v499_v15 = vsub.f32 %v243_v46, %v467_v25 }
  0xd4   :  { %v1089_v49 = vpop.eup %1088  ;;  %v404_v39 = vadd.f32 %v308_v14, %v180_v56  ;;  %v468_v20 = vmul.f32 16.0, %v308_v14  ;;  %v532_v23 = vmul.f32 16.0, %v372_v38  ;;  %v641_v60 = vsub.f32 %v435_v6, %v1472_v13 }
  0xd5   :  { %v973_v27 = vmin.f32 %v1089_v49, 0.99  ;;  %v776_v28 = vmul.f32 %v744_v18, %v604_v34  ;;  %v563_v22 = vadd.f32 %v531_v33, %v499_v15  ;;  %v150_v42 = vmul.f32 0.0625, %v118_v58 }
  0xd6   :  { %v436_v30 = vsub.f32 %v404_v39, %v372_v38  ;;  %v500_v37 = vsub.f32 %v244_v5, %v468_v20  ;;  %v713_v44 = vmul.f32 %v1479_v7, %v641_v60  ;;  %v809_v29 = vmul.f32 %v641_v60, %v641_v60 }
  0xd7   :  { %1005 = vst [vmem:[#allocation5 + $0xb8] sm:$0xff] %v973_v27  ;;  %v876_v43 = vadd.f32 %v844_v11, %v776_v28  ;;  %v245_v48 = vsub.f32 %v117_v55, %v213_v31  ;;  %v605_v24 = vsub.f32 %v563_v22, %v1476_v19  ;;  %v182_v17 = vfloor.f32 %v150_v42 }
  0xd8   :  { %v564_v47 = vadd.f32 %v532_v23, %v500_v37  ;;  %v642_v9 = vsub.f32 %v436_v30, %v1472_v13  ;;  %v845_v54 = vmul.f32 %v1486_v35, %v809_v29  ;;  %v53_v34 = vadd.s32 248, %v1174_v1 }
  0xd9   :  { %v1091_v45 = vpop.eup %1090  ;;  %v912_v51 = vadd.f32 %v1505_v2, %v876_v43  ;;  %vm277_vm10 = vcmp.ge.f32.partialorder %v245_v48, 16.0  ;;  %vm341_vm11 = vcmp.lt.f32.partialorder %v245_v48, 0.0  ;;  %v677_v50 = vmul.f32 %v1483_v36, %v605_v24 }
  0xda   :  { %v974_v16 = vmin.f32 %v1091_v45, 0.99  ;;  %v606_v53 = vsub.f32 %v564_v47, %v1476_v19  ;;  %v714_v55 = vmul.f32 %v1479_v7, %v642_v9  ;;  %v810_v46 = vmul.f32 %v642_v9, %v642_v9 }
  0xdb   :  { %1094 = vpow2.f32 %v912_v51  ;;  %v309_v56 = vsel %vm277_vm10, 1.0, %v1157_v41  ;;  %v373_v40 = vsel %vm341_vm11, 1.0, %v1157_v41  ;;  %v745_v52 = vadd.f32 %v713_v44, %v677_v50 }
  0xdc   :  { %1006 = vst [vmem:[#allocation5 + $0xc0] sm:$0xff] %v974_v16  ;;  %v678_v59 = vmul.f32 %v1483_v36, %v606_v53  ;;  %v405_v32 = vadd.f32 %v309_v56, %v181_v10  ;;  %v469_v57 = vmul.f32 16.0, %v309_v56  ;;  %v846_v61 = vmul.f32 %v1486_v35, %v810_v46 }
  0xdd   :  { %v533_v62 = vmul.f32 16.0, %v373_v40  ;;  %v214_v26 = vmul.f32 16.0, %v182_v17  ;;  %v1093_v3 = vpop.eup %1092  ;;  %v777_v0 = vmul.f32 %v745_v52, %v605_v24  ;;  %v119_v12 = vcvt.s32.f32 %v53_v34 }
  0xde   :  { %v746_v63 = vadd.f32 %v714_v55, %v678_v59  ;;  %v437_v4 = vsub.f32 %v405_v32, %v373_v40  ;;  %v501_v5 = vsub.f32 %v245_v48, %v469_v57  ;;  %v975_v21 = vmin.f32 %v1093_v3, 0.99 }
  0xdf   :  { %v246_v11 = vsub.f32 %v118_v58, %v214_v26  ;;  %v877_v25 = vadd.f32 %v845_v54, %v777_v0  ;;  %v151_v6 = vmul.f32 0.0625, %v119_v12 }
  0xe0   :  { %v778_v33 = vmul.f32 %v746_v63, %v606_v53  ;;  %v565_v10 = vadd.f32 %v533_v62, %v501_v5  ;;  %v643_v18 = vsub.f32 %v437_v4, %v1472_v13  ;;  %1007 = vst [vmem:[#allocation5 + $0xc8] sm:$0xff] %v975_v21 }
  0xe1   :  { %vm278_vm12 = vcmp.ge.f32.partialorder %v246_v11, 16.0  ;;  %vm342_vm13 = vcmp.lt.f32.partialorder %v246_v11, 0.0  ;;  %v913_v1 = vadd.f32 %v1505_v2, %v877_v25  ;;  %v183_v39 = vfloor.f32 %v151_v6 }
  0xe2   :  { %v878_v14 = vadd.f32 %v846_v61, %v778_v33  ;;  %v607_v38 = vsub.f32 %v565_v10, %v1476_v19  ;;  %v715_v49 = vmul.f32 %v1479_v7, %v643_v18  ;;  %v811_v15 = vmul.f32 %v643_v18, %v643_v18 }
  0xe3   :  { %v310_v8 = vsel %vm278_vm12, 1.0, %v1157_v41  ;;  %v374_v58 = vsel %vm342_vm13, 1.0, %v1157_v41  ;;  %1096 = vpow2.f32 %v913_v1  ;;  %v215_v31 = vmul.f32 16.0, %v183_v39 }
  0xe4   :  { %v914_v20 = vadd.f32 %v1505_v2, %v878_v14  ;;  %v679_v23 = vmul.f32 %v1483_v36, %v607_v38  ;;  %v406_v27 = vadd.f32 %v310_v8, %v182_v17  ;;  %v470_v28 = vmul.f32 16.0, %v310_v8 }
  0xe5   :  { %v534_v60 = vmul.f32 16.0, %v374_v58  ;;  %v847_v30 = vmul.f32 %v1486_v35, %v811_v15  ;;  %v247_v43 = vsub.f32 %v119_v12, %v215_v31 }
  0xe6   :  { %1098 = vpow2.f32 %v914_v20  ;;  %v747_v22 = vadd.f32 %v715_v49, %v679_v23  ;;  %v438_v37 = vsub.f32 %v406_v27, %v374_v58  ;;  %v502_v42 = vsub.f32 %v246_v11, %v470_v28 }
  0xe7   :  { %vm279_vm14 = vcmp.ge.f32.partialorder %v247_v43, 16.0  ;;  %vm343_vm15 = vcmp.lt.f32.partialorder %v247_v43, 0.0 }
  0xe8   :  { %v1095_v44 = vpop.eup %1094  ;;  %v779_v29 = vmul.f32 %v747_v22, %v607_v38  ;;  %v644_v48 = vsub.f32 %v438_v37, %v1472_v13  ;;  %v566_v47 = vadd.f32 %v534_v60, %v502_v42  ;;  %v311_v51 = vsel %vm279_vm14, 1.0, %v1157_v41 }
  0xe9   :  { %v976_v24 = vmin.f32 %v1095_v44, 0.99  ;;  %v375_v16 = vsel %vm343_vm15, 1.0, %v1157_v41  ;;  %v407_v50 = vadd.f32 %v311_v51, %v183_v39  ;;  %v471_v53 = vmul.f32 16.0, %v311_v51 }
  0xea   :  { %v879_v9 = vadd.f32 %v847_v30, %v779_v29  ;;  %v716_v17 = vmul.f32 %v1479_v7, %v644_v48  ;;  %v812_v45 = vmul.f32 %v644_v48, %v644_v48  ;;  %v608_v54 = vsub.f32 %v566_v47, %v1476_v19 }
  0xeb   :  { %1008 = vst [vmem:[#allocation5 + $0xd0] sm:$0xff] %v976_v24  ;;  %v535_v46 = vmul.f32 16.0, %v375_v16  ;;  %v439_v40 = vsub.f32 %v407_v50, %v375_v16  ;;  %v503_v52 = vsub.f32 %v247_v43, %v471_v53 }
  0xec   :  { %v915_v55 = vadd.f32 %v1505_v2, %v879_v9  ;;  %v680_v56 = vmul.f32 %v1483_v36, %v608_v54  ;;  %v848_v32 = vmul.f32 %v1486_v35, %v812_v45 }
  0xed   :  { %v567_v57 = vadd.f32 %v535_v46, %v503_v52  ;;  %v645_v61 = vsub.f32 %v439_v40, %v1472_v13 }
  0xee   :  { %1100 = vpow2.f32 %v915_v55  ;;  %v748_v59 = vadd.f32 %v716_v17, %v680_v56 }
  0xef   :  { %v609_v41 = vsub.f32 %v567_v57, %v1476_v19  ;;  %v717_v34 = vmul.f32 %v1479_v7, %v645_v61  ;;  %v813_v3 = vmul.f32 %v645_v61, %v645_v61 }
  0xf0   :  { %v1097_v62 = vpop.eup %1096  ;;  %v780_v26 = vmul.f32 %v748_v59, %v608_v54 }
  0xf1   :  { %v977_v0 = vmin.f32 %v1097_v62, 0.99  ;;  %v681_v5 = vmul.f32 %v1483_v36, %v609_v41  ;;  %v849_v25 = vmul.f32 %v1486_v35, %v813_v3 }
  0xf2   :  { %v880_v4 = vadd.f32 %v848_v32, %v780_v26 }
  0xf3   :  { %v1099_v63 = vpop.eup %1098  ;;  %1009 = vst [vmem:[#allocation5 + $0xd8] sm:$0xff] %v977_v0  ;;  %v749_v12 = vadd.f32 %v717_v34, %v681_v5 }
  0xf4   :  { %v978_v21 = vmin.f32 %v1099_v63, 0.99  ;;  %v916_v11 = vadd.f32 %v1505_v2, %v880_v4 }
  0xf5   :  { %v781_v13 = vmul.f32 %v749_v12, %v609_v41 }
  0xf6   :  { %1010 = vst [vmem:[#allocation5 + $0xe0] sm:$0xff] %v978_v21  ;;  %1102 = vpow2.f32 %v916_v11 }
  0xf7   :  { %v881_v33 = vadd.f32 %v849_v25, %v781_v13 }
  0xf9   :  { %v917_v7 = vadd.f32 %v1505_v2, %v881_v33 }
  0xfb   :  { %v1101_v19 = vpop.eup %1100  ;;  %1104 = vpow2.f32 %v917_v7 }
  0xfc   :  { %v979_v10 = vmin.f32 %v1101_v19, 0.99 }
  0xfe   :  { %1011 = vst [vmem:[#allocation5 + $0xe8] sm:$0xff] %v979_v10 }
 0x103   :  { %v1103_v18 = vpop.eup %1102 }
 0x104   :  { %v980_v6 = vmin.f32 %v1103_v18, 0.99 }
 0x106   :  { %1012 = vst [vmem:[#allocation5 + $0xf0] sm:$0xff] %v980_v6 }
 0x108   :  { %v1105_v36 = vpop.eup %1104 }
 0x109   :  { %v981_v1 = vmin.f32 %v1105_v36, 0.99 }
 0x10b   :  { %1013 = vst [vmem:[#allocation5 + $0xf8] sm:$0xff] %v981_v1 }
 0x10c   :  { %1143 = shalt.err (!%p1140_p9)
}
 0x10d   :  { %s1159_s13 = smov 128   ;;  %s1160_s14 = smov 8  }
 0x10e   :  { %1025 = dma.vmem_to_hbm [thread:$0]  %s1020_s11, 4096, %s1643_s1, [#allocation4], %s1159_s13, %s1159_s13, %s1160_s14  }
 0x10f   :  { %1154 = dma.done.wait [#allocation4], 4096  }
 0x110   :  { %1155 = vsyncadd [#allocation4], 4294963200 }
 0x111   :  { %1029 = vsyncpa [#allocation3], 1 }
 0x112   :  { %1030 = vsyncpa [#allocation4], 1 }

</bundles_post_ra>
